<compile_context>
chip_gen: v7x
topology: tpu7x:2x2x1
jax: 0.10.0
libtpu: 0.0.40
codegen_flags: <defaults>
</compile_context>

<pallas_src>
import functools
import math

import jax
import jax.numpy as jnp
from jax import lax
from jax.experimental import pallas as pl
from jax.experimental.pallas import tpu as pltpu


def _round_up(x, m):
    return ((x + m - 1) // m) * m


def _sigmoid(x):
    # 1/(1+exp(-x)); exp overflow -> inf still yields the correct 0.0 limit.
    return 1.0 / (1.0 + jnp.exp(-x))


def _lstm_cell(y, h0, c0, wih, whh, b, hp):
    """One LSTM cell step on padded tiles.  Gate blocks are HP(=128k)-aligned."""
    gates = (jnp.dot(y, wih, preferred_element_type=jnp.float32)
             + jnp.dot(h0, whh, preferred_element_type=jnp.float32)
             + b)                                            # (BS, 4*HP)
    i = _sigmoid(gates[:, 0 * hp:1 * hp])
    f = _sigmoid(gates[:, 1 * hp:2 * hp])
    g = jnp.tanh(gates[:, 2 * hp:3 * hp])
    o = _sigmoid(gates[:, 3 * hp:4 * hp])
    c_new = f * c0 + i * g
    h_new = o * jnp.tanh(c_new)
    return h_new, c_new


# ---------------------------------------------------------------------------
# Kernel 1: LSTM cell only (is_attended=False)
# ---------------------------------------------------------------------------
def _lstm_only_kernel(y_ref, h0_ref, c0_ref, wih_ref, whh_ref, b_ref,
                      h_ref, c_ref, *, hp):
    h_new, c_new = _lstm_cell(y_ref[...], h0_ref[...], c0_ref[...],
                              wih_ref[...], whh_ref[...], b_ref[...], hp)
    h_ref[...] = h_new
    c_ref[...] = c_new


# ---------------------------------------------------------------------------
# Kernel 2: fused LSTM cell + single-head MultiheadAttention (tgt_len == 1)
# ---------------------------------------------------------------------------
def _fused_kernel(y_ref, h0_ref, c0_ref, wih_ref, whh_ref, b_ref,
                  k_ref, v_ref, mask_ref,
                  wq_ref, wk_ref, wv_ref, wo_ref, battn_ref,
                  out_ref, attn_ref, h_ref, c_ref, *, hp, h_real, bs_pad):
    # ---- LSTM cell ----
    h_new, c_new = _lstm_cell(y_ref[...], h0_ref[...], c0_ref[...],
                              wih_ref[...], whh_ref[...], b_ref[...], hp)
    h_ref[...] = h_new
    c_ref[...] = c_new

    # ---- attention (query = h_new), 1 head, head_dim == hidden_dim ----
    SB = k_ref.shape[0]          # = S * BS  (flat key/value rows)
    SP = attn_ref.shape[1]       # lane-padded source length
    scale = 1.0 / math.sqrt(h_real)

    bq = battn_ref[0:1, :]
    bk = battn_ref[1:2, :]
    bv = battn_ref[2:3, :]
    bo = battn_ref[3:4, :]

    q = (jnp.dot(h_new, wq_ref[...], preferred_element_type=jnp.float32)
         + bq) * scale                                       # (BS, HP)
    kp = jnp.dot(k_ref[...], wk_ref[...],
                 preferred_element_type=jnp.float32) + bk    # (SB, HP)
    vp = jnp.dot(v_ref[...], wv_ref[...],
                 preferred_element_type=jnp.float32) + bv    # (SB, HP)

    # Cross-batch scores M[b, s*BS+b'] = q[b] . kp[s*BS+b']; the additive mask
    # keeps only b' == b (block-diagonal attention in a flat 2-D layout).
    scores = lax.dot_general(q, kp, (((1,), (1,)), ((), ())),
                             preferred_element_type=jnp.float32)  # (BS, SB)
    scores = scores + mask_ref[...]
    m = jnp.max(scores, axis=-1, keepdims=True)
    e = jnp.exp(scores - m)                                  # masked -> exact 0
    r = pl.reciprocal(jnp.sum(e, axis=-1, keepdims=True))    # (BS, 1)

    # context = softmax(scores) @ vp  ==  (e @ vp) * (1/denom)
    ctx = jnp.dot(e, vp, preferred_element_type=jnp.float32) * r   # (BS, HP)
    out_ref[...] = (jnp.dot(ctx, wo_ref[...], preferred_element_type=jnp.float32)
                    + bo)

    # Compact (BS, S) attention weights: select each row's diagonal block with
    # a {0,1} projection built from iotas (P[j, s] = 1 iff s*BS <= j < (s+1)*BS,
    # i.e. j // BS == s — expressed without integer division).
    j_idx = lax.broadcasted_iota(jnp.int32, (SB, SP), 0)
    s_idx = lax.broadcasted_iota(jnp.int32, (SB, SP), 1)
    d = j_idx - s_idx * bs_pad
    pmat = jnp.where((d >= 0) & (d < bs_pad),
                     jnp.float32(1.0), jnp.float32(0.0))     # (SB, SP)
    attn_ref[...] = jnp.dot(e, pmat, preferred_element_type=jnp.float32) * r


# ---------------------------------------------------------------------------
# One-time parameter preparation (transpose + pad) -- outside the decode loop
# ---------------------------------------------------------------------------
def prepare_params(params, input_dim, hidden_dim, is_attended):
    H = hidden_dim
    HP = _round_up(H, 128)
    ph = HP - H

    wih = params["w_ih"].T.reshape(input_dim, 4, H)          # gate-major blocks
    wih = jnp.pad(wih, ((0, 0), (0, 0), (0, ph))).reshape(input_dim, 4 * HP)
    whh = params["w_hh"].T.reshape(H, 4, H)
    whh = jnp.pad(whh, ((0, ph), (0, 0), (0, ph))).reshape(HP, 4 * HP)
    b = (params["b_ih"] + params["b_hh"]).reshape(4, H)
    b = jnp.pad(b, ((0, 0), (0, ph))).reshape(1, 4 * HP)
    prep = {"wih": wih, "whh": whh, "b": b}

    if is_attended:
        E = H
        b_attn = jnp.stack([
            params["in_proj_bias"][0:E],
            params["in_proj_bias"][E:2 * E],
            params["in_proj_bias"][2 * E:3 * E],
            params["out_proj_bias"],
        ])                                                   # (4, H): q,k,v,o
        prep.update(
            wq=jnp.pad(params["q_proj_weight"].T, ((0, ph), (0, ph))),
            wk=jnp.pad(params["k_proj_weight"].T, ((0, 0), (0, ph))),
            wv=jnp.pad(params["v_proj_weight"].T, ((0, 0), (0, ph))),
            wo=jnp.pad(params["out_proj_weight"].T, ((0, ph), (0, ph))),
            b_attn=jnp.pad(b_attn, ((0, 0), (0, ph))),
        )
    return prep


# ---------------------------------------------------------------------------
# Wrapper replicating LSTM_Layer.forward
# ---------------------------------------------------------------------------
def lstm_layer_forward(y, prev, prep, k=None, v=None, is_attended=False):
    """y:(1,bs,In)  prev=(h0,c0):(1,bs,H)  k:(S,bs,kdim)  v:(S,bs,vdim)."""
    h0, c0 = prev
    bs = y.shape[1]
    H = h0.shape[2]
    HP = prep["whh"].shape[0]
    BS = _round_up(max(bs, 8), 8)

    y_p = jnp.pad(y[0], ((0, BS - bs), (0, 0)))
    h0_p = jnp.pad(h0[0], ((0, BS - bs), (0, HP - H)))
    c0_p = jnp.pad(c0[0], ((0, BS - bs), (0, HP - H)))

    vmem = pl.BlockSpec(memory_space=pltpu.MemorySpace.VMEM)

    if not is_attended:
        h_p, c_p = pl.pallas_call(
            functools.partial(_lstm_only_kernel, hp=HP),
            out_shape=(jax.ShapeDtypeStruct((BS, HP), jnp.float32),
                       jax.ShapeDtypeStruct((BS, HP), jnp.float32)),
            in_specs=[vmem] * 6,
            out_specs=(vmem, vmem),
        )(y_p, h0_p, c0_p, prep["wih"], prep["whh"], prep["b"])
        h = h_p[:bs, :H][None]
        c = c_p[:bs, :H][None]
        return h, None, (h, c)

    S, _, Kd = k.shape
    Vd = v.shape[2]
    SP = _round_up(S, 128)
    # Pad batch to a full sublane tile and flatten to (S*BS, Kd): contiguous,
    # zero-copy reshape; projections become single lane-dense MXU matmuls.
    k_p = jnp.pad(k, ((0, 0), (0, BS - bs), (0, 0))).reshape(S * BS, Kd)
    v_p = jnp.pad(v, ((0, 0), (0, BS - bs), (0, 0))).reshape(S * BS, Vd)
    # Additive block-diagonal mask (tiny constant, folded under jit): query row
    # b only attends to flat key columns j with j % BS == b.
    col_b = jnp.arange(S * BS, dtype=jnp.int32) % BS
    bmask = jnp.where(col_b[None, :] == jnp.arange(BS, dtype=jnp.int32)[:, None],
                      jnp.float32(0.0), jnp.float32(-1e30))   # (BS, S*BS)

    out_p, attn_p, h_p, c_p = pl.pallas_call(
        functools.partial(_fused_kernel, hp=HP, h_real=H, bs_pad=BS),
        out_shape=(jax.ShapeDtypeStruct((BS, HP), jnp.float32),
                   jax.ShapeDtypeStruct((BS, SP), jnp.float32),
                   jax.ShapeDtypeStruct((BS, HP), jnp.float32),
                   jax.ShapeDtypeStruct((BS, HP), jnp.float32)),
        in_specs=[vmem] * 14,
        out_specs=(vmem, vmem, vmem, vmem),
    )(y_p, h0_p, c0_p, prep["wih"], prep["whh"], prep["b"],
      k_p, v_p, bmask,
      prep["wq"], prep["wk"], prep["wv"], prep["wo"], prep["b_attn"])

    output = out_p[:bs, :H][None]                             # (1, bs, H)
    attn_w = attn_p[:bs, :S][:, None, :]                      # (bs, 1, S)
    h = h_p[:bs, :H][None]
    c = c_p[:bs, :H][None]
    return output, attn_w, (h, c)


# ---------------------------------------------------------------------------
# Deterministic parameter init (shapes follow nn.LSTM / nn.MultiheadAttention)
# ---------------------------------------------------------------------------
def init_params(key, input_dim, hidden_dim, kdim, vdim):
    keys = jax.random.split(key, 10)
    s = 1.0 / math.sqrt(hidden_dim)

    def u(k, shape):
        return jax.random.uniform(k, shape, jnp.float32, -s, s)

    E = hidden_dim
    return {
        "w_ih": u(keys[0], (4 * hidden_dim, input_dim)),
        "w_hh": u(keys[1], (4 * hidden_dim, hidden_dim)),
        "b_ih": u(keys[2], (4 * hidden_dim,)),
        "b_hh": u(keys[3], (4 * hidden_dim,)),
        "q_proj_weight": u(keys[4], (E, E)),
        "k_proj_weight": u(keys[5], (E, kdim)),
        "v_proj_weight": u(keys[6], (E, vdim)),
        "in_proj_bias": u(keys[7], (3 * E,)),
        "out_proj_weight": u(keys[8], (E, E)),
        "out_proj_bias": u(keys[9], (E,)),
    }


# ---------------------------------------------------------------------------
# Pure-JAX reference (mirrors torch semantics) for correctness check
# ---------------------------------------------------------------------------
def reference_forward(y, prev, params, k, v):
    h0, c0 = prev
    H = h0.shape[2]
    gates = (y[0] @ params["w_ih"].T + h0[0] @ params["w_hh"].T
             + params["b_ih"] + params["b_hh"])
    i = jax.nn.sigmoid(gates[:, :H]); f = jax.nn.sigmoid(gates[:, H:2 * H])
    g = jnp.tanh(gates[:, 2 * H:3 * H]); o = jax.nn.sigmoid(gates[:, 3 * H:])
    c1 = f * c0[0] + i * g
    h1 = o * jnp.tanh(c1)
    E = H
    scale = 1.0 / math.sqrt(E)
    q = (h1 @ params["q_proj_weight"].T + params["in_proj_bias"][:E]) * scale
    kp = jnp.einsum("sbk,ek->sbe", k, params["k_proj_weight"]) + params["in_proj_bias"][E:2 * E]
    vp = jnp.einsum("sbv,ev->sbe", v, params["v_proj_weight"]) + params["in_proj_bias"][2 * E:]
    scores = jnp.einsum("be,sbe->bs", q, kp)
    attn = jax.nn.softmax(scores, axis=-1)
    ctx = jnp.einsum("bs,sbe->be", attn, vp)
    out = ctx @ params["out_proj_weight"].T + params["out_proj_bias"]
    return out[None], attn[:, None, :], (h1[None], c1[None])


if __name__ == "__main__":
    bs, In, H, Kd, Vd, S = 2, 16, 32, 64, 64, 49   # small but shape-faithful (S=49)
    key = jax.random.PRNGKey(0)
    kp_, ky, kh, kc, kk, kv = jax.random.split(key, 6)
    params = init_params(kp_, In, H, Kd, Vd)
    prep = prepare_params(params, In, H, is_attended=True)    # one-time pad/transpose

    y = jax.random.normal(ky, (1, bs, In), jnp.float32)
    h0 = jax.random.normal(kh, (1, bs, H), jnp.float32)
    c0 = jax.random.normal(kc, (1, bs, H), jnp.float32)
    k = jax.random.normal(kk, (S, bs, Kd), jnp.float32)
    v = jax.random.normal(kv, (S, bs, Vd), jnp.float32)

    fwd_att = jax.jit(functools.partial(lstm_layer_forward, is_attended=True))
    out, attn_w, (h1, c1) = fwd_att(y, (h0, c0), prep, k=k, v=v)
    jax.block_until_ready((out, attn_w, h1, c1))

    fwd_plain = jax.jit(functools.partial(lstm_layer_forward, is_attended=False))
    o2, _, (h2, c2) = fwd_plain(y, (h0, c0), prep)
    jax.block_until_ready((o2, h2, c2))

    ro, ra, (rh, rc) = reference_forward(y, (h0, c0), params, k, v)

    assert out.shape == (1, bs, H) and attn_w.shape == (bs, 1, S)
    assert jnp.allclose(h1, rh, atol=1e-3, rtol=1e-3)
    assert jnp.allclose(c1, rc, atol=1e-3, rtol=1e-3)
    assert jnp.allclose(attn_w, ra, atol=1e-3, rtol=1e-3)
    assert jnp.allclose(out, ro, atol=5e-3, rtol=5e-3)
    # LSTM-only path: output == new hidden state
    assert jnp.allclose(h2, rh, atol=1e-3, rtol=1e-3)
    assert jnp.allclose(c2, rc, atol=1e-3, rtol=1e-3)
    assert jnp.allclose(o2, rh, atol=1e-3, rtol=1e-3)
    print("KERNEL_OK")
</pallas_src>

<mosaic_0001>
module attributes {stable_mosaic.version = 11 : i64} {
  func.func @_fused_kernel(%arg0: memref<8x16xf32, #tpu.memory_space<vmem>>, %arg1: memref<8x128xf32, #tpu.memory_space<vmem>>, %arg2: memref<8x128xf32, #tpu.memory_space<vmem>>, %arg3: memref<16x512xf32, #tpu.memory_space<vmem>>, %arg4: memref<128x512xf32, #tpu.memory_space<vmem>>, %arg5: memref<1x512xf32, #tpu.memory_space<vmem>>, %arg6: memref<392x64xf32, #tpu.memory_space<vmem>>, %arg7: memref<392x64xf32, #tpu.memory_space<vmem>>, %arg8: memref<8x392xf32, #tpu.memory_space<vmem>>, %arg9: memref<128x128xf32, #tpu.memory_space<vmem>>, %arg10: memref<64x128xf32, #tpu.memory_space<vmem>>, %arg11: memref<64x128xf32, #tpu.memory_space<vmem>>, %arg12: memref<128x128xf32, #tpu.memory_space<vmem>>, %arg13: memref<4x128xf32, #tpu.memory_space<vmem>>, %arg14: memref<8x128xf32, #tpu.memory_space<vmem>>, %arg15: memref<8x128xf32, #tpu.memory_space<vmem>>, %arg16: memref<8x128xf32, #tpu.memory_space<vmem>>, %arg17: memref<8x128xf32, #tpu.memory_space<vmem>>) attributes {dimension_semantics = [], scalar_prefetch = 0 : i64, scratch_operands = 0 : i64, tpu.core_type = #tpu.core_type<tc>} {
    %c0 = arith.constant 0 : index
    %c0_0 = arith.constant 0 : index
    %0 = vector.load %arg0[%c0, %c0_0] : memref<8x16xf32, #tpu.memory_space<vmem>>, vector<8x16xf32>
    %c0_1 = arith.constant 0 : index
    %c0_2 = arith.constant 0 : index
    %1 = vector.load %arg1[%c0_1, %c0_2] : memref<8x128xf32, #tpu.memory_space<vmem>>, vector<8x128xf32>
    %c0_3 = arith.constant 0 : index
    %c0_4 = arith.constant 0 : index
    %2 = vector.load %arg2[%c0_3, %c0_4] : memref<8x128xf32, #tpu.memory_space<vmem>>, vector<8x128xf32>
    %c0_5 = arith.constant 0 : index
    %c0_6 = arith.constant 0 : index
    %3 = vector.load %arg3[%c0_5, %c0_6] : memref<16x512xf32, #tpu.memory_space<vmem>>, vector<16x512xf32>
    %c0_7 = arith.constant 0 : index
    %c0_8 = arith.constant 0 : index
    %4 = vector.load %arg4[%c0_7, %c0_8] : memref<128x512xf32, #tpu.memory_space<vmem>>, vector<128x512xf32>
    %c0_9 = arith.constant 0 : index
    %c0_10 = arith.constant 0 : index
    %5 = vector.load %arg5[%c0_9, %c0_10] : memref<1x512xf32, #tpu.memory_space<vmem>>, vector<1x512xf32>
    %cst = arith.constant dense<0.000000e+00> : vector<8x512xf32>
    %6 = tpu.matmul %0, %3, %cst {dimension_numbers = #tpu.dot_dimension_numbers<[1], [0], [0], [1], [0, 0, 1, 1], [], []>} : vector<8x16xf32>, vector<16x512xf32>, vector<8x512xf32> -> vector<8x512xf32>
    %cst_11 = arith.constant dense<0.000000e+00> : vector<8x512xf32>
    %7 = tpu.matmul %1, %4, %cst_11 {dimension_numbers = #tpu.dot_dimension_numbers<[1], [0], [0], [1], [0, 0, 1, 1], [], []>} : vector<8x128xf32>, vector<128x512xf32>, vector<8x512xf32> -> vector<8x512xf32>
    %8 = arith.addf %6, %7 : vector<8x512xf32>
    %9 = vector.broadcast %5 : vector<1x512xf32> to vector<8x512xf32>
    %10 = arith.addf %8, %9 : vector<8x512xf32>
    %11 = vector.extract_strided_slice %10 {offsets = [0, 0], sizes = [8, 128], strides = [1, 1]} : vector<8x512xf32> to vector<8x128xf32>
    %cst_12 = arith.constant 0.000000e+00 : f32
    %12 = vector.broadcast %cst_12 : f32 to vector<8x128xf32>
    %13 = arith.subf %12, %11 : vector<8x128xf32>
    %14 = math.exp %13 : vector<8x128xf32>
    %cst_13 = arith.constant 1.000000e+00 : f32
    %15 = vector.broadcast %cst_13 : f32 to vector<8x128xf32>
    %16 = arith.addf %15, %14 : vector<8x128xf32>
    %cst_14 = arith.constant 1.000000e+00 : f32
    %17 = vector.broadcast %cst_14 : f32 to vector<8x128xf32>
    %18 = arith.divf %17, %16 : vector<8x128xf32>
    %19 = vector.extract_strided_slice %10 {offsets = [0, 128], sizes = [8, 128], strides = [1, 1]} : vector<8x512xf32> to vector<8x128xf32>
    %cst_15 = arith.constant 0.000000e+00 : f32
    %20 = vector.broadcast %cst_15 : f32 to vector<8x128xf32>
    %21 = arith.subf %20, %19 : vector<8x128xf32>
    %22 = math.exp %21 : vector<8x128xf32>
    %cst_16 = arith.constant 1.000000e+00 : f32
    %23 = vector.broadcast %cst_16 : f32 to vector<8x128xf32>
    %24 = arith.addf %23, %22 : vector<8x128xf32>
    %cst_17 = arith.constant 1.000000e+00 : f32
    %25 = vector.broadcast %cst_17 : f32 to vector<8x128xf32>
    %26 = arith.divf %25, %24 : vector<8x128xf32>
    %27 = vector.extract_strided_slice %10 {offsets = [0, 256], sizes = [8, 128], strides = [1, 1]} : vector<8x512xf32> to vector<8x128xf32>
    %28 = math.tanh %27 : vector<8x128xf32>
    %29 = vector.extract_strided_slice %10 {offsets = [0, 384], sizes = [8, 128], strides = [1, 1]} : vector<8x512xf32> to vector<8x128xf32>
    %cst_18 = arith.constant 0.000000e+00 : f32
    %30 = vector.broadcast %cst_18 : f32 to vector<8x128xf32>
    %31 = arith.subf %30, %29 : vector<8x128xf32>
    %32 = math.exp %31 : vector<8x128xf32>
    %cst_19 = arith.constant 1.000000e+00 : f32
    %33 = vector.broadcast %cst_19 : f32 to vector<8x128xf32>
    %34 = arith.addf %33, %32 : vector<8x128xf32>
    %cst_20 = arith.constant 1.000000e+00 : f32
    %35 = vector.broadcast %cst_20 : f32 to vector<8x128xf32>
    %36 = arith.divf %35, %34 : vector<8x128xf32>
    %37 = arith.mulf %26, %2 : vector<8x128xf32>
    %38 = arith.mulf %18, %28 : vector<8x128xf32>
    %39 = arith.addf %37, %38 : vector<8x128xf32>
    %40 = math.tanh %39 : vector<8x128xf32>
    %41 = arith.mulf %36, %40 : vector<8x128xf32>
    %c0_21 = arith.constant 0 : index
    %c0_22 = arith.constant 0 : index
    %42 = vector.load %arg16[%c0_21, %c0_22] : memref<8x128xf32, #tpu.memory_space<vmem>>, vector<8x128xf32>
    tpu.vector_store %arg16[%c0_21, %c0_22], %41 {strides = array<i32>} : memref<8x128xf32, #tpu.memory_space<vmem>>, vector<8x128xf32>,
    %c0_23 = arith.constant 0 : index
    %c0_24 = arith.constant 0 : index
    %43 = vector.load %arg17[%c0_23, %c0_24] : memref<8x128xf32, #tpu.memory_space<vmem>>, vector<8x128xf32>
    tpu.vector_store %arg17[%c0_23, %c0_24], %39 {strides = array<i32>} : memref<8x128xf32, #tpu.memory_space<vmem>>, vector<8x128xf32>,
    %c0_25 = arith.constant 0 : index
    %c0_26 = arith.constant 0 : index
    %44 = vector.load %arg13[%c0_25, %c0_26] : memref<4x128xf32, #tpu.memory_space<vmem>>, vector<1x128xf32>
    %c1 = arith.constant 1 : index
    %c0_27 = arith.constant 0 : index
    %45 = vector.load %arg13[%c1, %c0_27] : memref<4x128xf32, #tpu.memory_space<vmem>>, vector<1x128xf32>
    %c2 = arith.constant 2 : index
    %c0_28 = arith.constant 0 : index
    %46 = vector.load %arg13[%c2, %c0_28] : memref<4x128xf32, #tpu.memory_space<vmem>>, vector<1x128xf32>
    %c3 = arith.constant 3 : index
    %c0_29 = arith.constant 0 : index
    %47 = vector.load %arg13[%c3, %c0_29] : memref<4x128xf32, #tpu.memory_space<vmem>>, vector<1x128xf32>
    %c0_30 = arith.constant 0 : index
    %c0_31 = arith.constant 0 : index
    %48 = vector.load %arg9[%c0_30, %c0_31] : memref<128x128xf32, #tpu.memory_space<vmem>>, vector<128x128xf32>
    %cst_32 = arith.constant dense<0.000000e+00> : vector<8x128xf32>
    %49 = tpu.matmul %41, %48, %cst_32 {dimension_numbers = #tpu.dot_dimension_numbers<[1], [0], [0], [1], [0, 0, 1, 1], [], []>} : vector<8x128xf32>, vector<128x128xf32>, vector<8x128xf32> -> vector<8x128xf32>
    %50 = vector.broadcast %44 : vector<1x128xf32> to vector<8x128xf32>
    %51 = arith.addf %49, %50 : vector<8x128xf32>
    %cst_33 = arith.constant 0.176776692 : f32
    %52 = vector.broadcast %cst_33 : f32 to vector<8x128xf32>
    %53 = arith.mulf %51, %52 : vector<8x128xf32>
    %c0_34 = arith.constant 0 : index
    %c0_35 = arith.constant 0 : index
    %54 = vector.load %arg6[%c0_34, %c0_35] : memref<392x64xf32, #tpu.memory_space<vmem>>, vector<392x64xf32>
    %c0_36 = arith.constant 0 : index
    %c0_37 = arith.constant 0 : index
    %55 = vector.load %arg10[%c0_36, %c0_37] : memref<64x128xf32, #tpu.memory_space<vmem>>, vector<64x128xf32>
    %cst_38 = arith.constant dense<0.000000e+00> : vector<392x128xf32>
    %56 = tpu.matmul %54, %55, %cst_38 {dimension_numbers = #tpu.dot_dimension_numbers<[1], [0], [0], [1], [0, 0, 1, 1], [], []>} : vector<392x64xf32>, vector<64x128xf32>, vector<392x128xf32> -> vector<392x128xf32>
    %57 = vector.broadcast %45 : vector<1x128xf32> to vector<392x128xf32>
    %58 = arith.addf %56, %57 : vector<392x128xf32>
    %c0_39 = arith.constant 0 : index
    %c0_40 = arith.constant 0 : index
    %59 = vector.load %arg7[%c0_39, %c0_40] : memref<392x64xf32, #tpu.memory_space<vmem>>, vector<392x64xf32>
    %c0_41 = arith.constant 0 : index
    %c0_42 = arith.constant 0 : index
    %60 = vector.load %arg11[%c0_41, %c0_42] : memref<64x128xf32, #tpu.memory_space<vmem>>, vector<64x128xf32>
    %cst_43 = arith.constant dense<0.000000e+00> : vector<392x128xf32>
    %61 = tpu.matmul %59, %60, %cst_43 {dimension_numbers = #tpu.dot_dimension_numbers<[1], [0], [0], [1], [0, 0, 1, 1], [], []>} : vector<392x64xf32>, vector<64x128xf32>, vector<392x128xf32> -> vector<392x128xf32>
    %62 = vector.broadcast %46 : vector<1x128xf32> to vector<392x128xf32>
    %63 = arith.addf %61, %62 : vector<392x128xf32>
    %cst_44 = arith.constant dense<0.000000e+00> : vector<8x392xf32>
    %64 = tpu.matmul %53, %58, %cst_44 {dimension_numbers = #tpu.dot_dimension_numbers<[1], [1], [0], [0], [0, 0, 1, 0], [], []>} : vector<8x128xf32>, vector<392x128xf32>, vector<8x392xf32> -> vector<8x392xf32>
    %c0_45 = arith.constant 0 : index
    %c0_46 = arith.constant 0 : index
    %65 = vector.load %arg8[%c0_45, %c0_46] : memref<8x392xf32, #tpu.memory_space<vmem>>, vector<8x392xf32>
    %66 = arith.addf %64, %65 : vector<8x392xf32>
    %cst_47 = arith.constant dense<0xFF800000> : vector<8xf32>
    %67 = vector.multi_reduction <maximumf>, %66, %cst_47 [1] : vector<8x392xf32> to vector<8xf32>
    %68 = vector.shape_cast %67 : vector<8xf32> to vector<8x1xf32>
    %69 = vector.broadcast %68 : vector<8x1xf32> to vector<8x392xf32>
    %70 = arith.subf %66, %69 : vector<8x392xf32>
    %71 = math.exp %70 : vector<8x392xf32>
    %cst_48 = arith.constant dense<0.000000e+00> : vector<8xf32>
    %72 = vector.multi_reduction <add>, %71, %cst_48 [1] : vector<8x392xf32> to vector<8xf32>
    %73 = vector.shape_cast %72 : vector<8xf32> to vector<8x1xf32>
    %74 = tpu.reciprocal %73 : vector<8x1xf32> -> vector<8x1xf32>
    %cst_49 = arith.constant dense<0.000000e+00> : vector<8x128xf32>
    %75 = tpu.matmul %71, %63, %cst_49 {dimension_numbers = #tpu.dot_dimension_numbers<[1], [0], [0], [1], [0, 0, 1, 1], [], []>} : vector<8x392xf32>, vector<392x128xf32>, vector<8x128xf32> -> vector<8x128xf32>
    %76 = vector.broadcast %74 : vector<8x1xf32> to vector<8x128xf32>
    %77 = arith.mulf %75, %76 : vector<8x128xf32>
    %c0_50 = arith.constant 0 : index
    %c0_51 = arith.constant 0 : index
    %78 = vector.load %arg12[%c0_50, %c0_51] : memref<128x128xf32, #tpu.memory_space<vmem>>, vector<128x128xf32>
    %cst_52 = arith.constant dense<0.000000e+00> : vector<8x128xf32>
    %79 = tpu.matmul %77, %78, %cst_52 {dimension_numbers = #tpu.dot_dimension_numbers<[1], [0], [0], [1], [0, 0, 1, 1], [], []>} : vector<8x128xf32>, vector<128x128xf32>, vector<8x128xf32> -> vector<8x128xf32>
    %80 = vector.broadcast %47 : vector<1x128xf32> to vector<8x128xf32>
    %81 = arith.addf %79, %80 : vector<8x128xf32>
    %c0_53 = arith.constant 0 : index
    %c0_54 = arith.constant 0 : index
    %82 = vector.load %arg14[%c0_53, %c0_54] : memref<8x128xf32, #tpu.memory_space<vmem>>, vector<8x128xf32>
    tpu.vector_store %arg14[%c0_53, %c0_54], %81 {strides = array<i32>} : memref<8x128xf32, #tpu.memory_space<vmem>>, vector<8x128xf32>,
    %83 = tpu.iota {dimensions = array<i32: 0>} : vector<392x128xi32>
    %84 = tpu.iota {dimensions = array<i32: 1>} : vector<392x128xi32>
    %c8_i32 = arith.constant 8 : i32
    %85 = vector.broadcast %c8_i32 : i32 to vector<392x128xi32>
    %86 = arith.muli %84, %85 : vector<392x128xi32>
    %87 = arith.subi %83, %86 : vector<392x128xi32>
    %c0_i32 = arith.constant 0 : i32
    %88 = vector.broadcast %c0_i32 : i32 to vector<392x128xi32>
    %89 = arith.cmpi sge, %87, %88 : vector<392x128xi32>
    %c8_i32_55 = arith.constant 8 : i32
    %90 = vector.broadcast %c8_i32_55 : i32 to vector<392x128xi32>
    %91 = arith.cmpi slt, %87, %90 : vector<392x128xi32>
    %92 = arith.andi %89, %91 : vector<392x128xi1>
    %cst_56 = arith.constant 1.000000e+00 : f32
    %cst_57 = arith.constant 0.000000e+00 : f32
    %93 = vector.broadcast %cst_56 : f32 to vector<392x128xf32>
    %94 = vector.broadcast %cst_57 : f32 to vector<392x128xf32>
    %95 = arith.select %92, %93, %94 : vector<392x128xi1>, vector<392x128xf32>
    %cst_58 = arith.constant dense<0.000000e+00> : vector<8x128xf32>
    %96 = tpu.matmul %71, %95, %cst_58 {dimension_numbers = #tpu.dot_dimension_numbers<[1], [0], [0], [1], [0, 0, 1, 1], [], []>} : vector<8x392xf32>, vector<392x128xf32>, vector<8x128xf32> -> vector<8x128xf32>
    %97 = vector.broadcast %74 : vector<8x1xf32> to vector<8x128xf32>
    %98 = arith.mulf %96, %97 : vector<8x128xf32>
    %c0_59 = arith.constant 0 : index
    %c0_60 = arith.constant 0 : index
    %99 = vector.load %arg15[%c0_59, %c0_60] : memref<8x128xf32, #tpu.memory_space<vmem>>, vector<8x128xf32>
    tpu.vector_store %arg15[%c0_59, %c0_60], %98 {strides = array<i32>} : memref<8x128xf32, #tpu.memory_space<vmem>>, vector<8x128xf32>,
    return
  }
}

</mosaic_0001>

<bundles_post_ra>
// kernel: lstm_layer_forward.1
= control target key start
LH: loop header
LB: loop body
LE: loop exit
PB: predicated region body
PF: predicated region fallthrough
CT: control target
= control target key end

     0   :  { %s5523_s0 = inlined_call_operand.vmem [shape: f32[8,16], index: 0, kind: input, shape index: {}]   ;;  %s5524_s1 = inlined_call_operand.vmem [shape: f32[8,128], index: 1, kind: input, shape index: {}]   ;;  %s5525_s2 = inlined_call_operand.vmem [shape: f32[8,128], index: 2, kind: input, shape index: {}]   ;;  %s5526_s3 = inlined_call_operand.vmem [shape: f32[16,512], index: 3, kind: input, shape index: {}]   ;;  %s5527_s4 = inlined_call_operand.vmem [shape: f32[128,512], index: 4, kind: input, shape index: {}]   ;;  %s5528_s5 = inlined_call_operand.vmem [shape: f32[1,512], index: 5, kind: input, shape index: {}]   ;;  %s5529_s6 = inlined_call_operand.vmem [shape: f32[392,64], index: 6, kind: input, shape index: {}]   ;;  %s5530_s7 = inlined_call_operand.vmem [shape: f32[392,64], index: 7, kind: input, shape index: {}]   ;;  %s5531_s8 = inlined_call_operand.vmem [shape: f32[8,392], index: 8, kind: input, shape index: {}]   ;;  %s5532_s9 = inlined_call_operand.vmem [shape: f32[128,128], index: 9, kind: input, shape index: {}]   ;;  %s5533_s10 = inlined_call_operand.vmem [shape: f32[64,128], index: 10, kind: input, shape index: {}]   ;;  %s5534_s11 = inlined_call_operand.hbm [shape: f32[64,128], index: 11, kind: input, shape index: {}]   ;;  %s5535_s12 = inlined_call_operand.vmem [shape: f32[128,128], index: 12, kind: input, shape index: {}]   ;;  %s5536_s13 = inlined_call_operand.vmem [shape: f32[4,128], index: 13, kind: input, shape index: {}]   ;;  %s5537_s14 = inlined_call_operand.vmem [shape: f32[8,128], index: 14, kind: output, shape index: {0}]   ;;  %s5538_s15 = inlined_call_operand.vmem [shape: f32[8,128], index: 15, kind: output, shape index: {1}]   ;;  %s5539_s16 = inlined_call_operand.vmem [shape: f32[8,128], index: 16, kind: output, shape index: {2}]   ;;  %s5540_s17 = inlined_call_operand.vmem [shape: f32[8,128], index: 17, kind: output, shape index: {3}]  }
   0x1   :  { %5562 = sst [smem:[#allocation5_spill]] %s5523_s0 }
   0x2   :  { %5563 = sst [smem:[#allocation6_spill]] %s5524_s1 }
   0x3   :  { %23 = vsyncpa [#allocation3], 0  ;;  %s3653_s24 = smov [#allocation2]   ;;  %s3629_s28 = scalar_lea.hbm %s5534_s11, 1024 }
   0x4   :  { %s51_s25 = sshll.u32 %s3653_s24, 4  ;;  %p3630_p0 = scmp.ne.s32.totalorder %s5534_s11, %s3629_s28  ;;  %s52_s25 = int_to_ptr.vmem [resolvable:$true] %s51_s25 }
   0x5   :  { %p3633_p1 = scmp.lt.u32.totalorder %s3629_s28, %s5534_s11 }
   0x7   :  { %p3635_p2 = pnand %p3633_p1, %p3630_p0 }
   0x9   :  { %3638 = shalt.err (!%p3635_p2)
}
   0xa   :  { %s3639_s19 = scalar_lea.vmem %s52_s25, 1024  ;;  %p3644_p4 = scmp.lt.s32.totalorder %s52_s25, %s52_s25 }
   0xb   :  { %p3640_p3 = scmp.ne.s32.totalorder %s52_s25, %s3639_s19  ;;  %p3645_p5 = scmp.lt.s32.totalorder %s3639_s19, %s3639_s19 }
   0xd   :  { %p3646_p6 = por %p3645_p5, %p3644_p4 }
   0xf   :  { %p3647_p7 = pnand %p3646_p6, %p3640_p3 }
  0x11   :  { %3650 = shalt.err (!%p3647_p7)
}
  0x12   :  { %s3654_s1 = smov 128   ;;  %s3655_s20 = smov 8  }
  0x13   :  { %57 = dma.hbm_to_vmem [thread:$0]  %s5534_s11, 1024, %s52_s25, [#allocation3], %s3654_s1, %s3654_s1, %s3655_s20  }
  0x14   :  { %3651 = dma.done.wait [#allocation3], 1024  }
  0x15   :  { %3652 = vsyncadd [#allocation3], 4294966272  ;;  %v3656_v0 = vmov 0.0   ;;  %v77_v1 = vld [vmem:[%s5527_s4 + $0x8] sm:$0xff]  ;;  %v79_v3 = vld [vmem:[%s5527_s4 + $0x18] sm:$0xff]  ;;  %s5564_s24 = sld [smem:[#allocation6_spill]] }
  0x16   :  { %205 = vmatprep.mubr.f32.mxu0 %v3656_v0  ;;  %276 = vmatprep.mubr.f32.mxu1 %v3656_v0  ;;  %v81_v2 = vld [vmem:[%s5527_s4 + $0x28] sm:$0xff]  ;;  %v83_v5 = vld [vmem:[%s5527_s4 + $0x38] sm:$0xff]  ;;  %v76_v6 = vld [vmem:[%s5527_s4] sm:$0xff]  ;;  %s5565_s25 = sld [smem:[#allocation5_spill]]  ;;  %vm283_vm0 = vcmask 130048   ;;  %vm3658_vm1 = vmmov 0  }
  0x17   :  { %v3279_v4 = vpack.c.bf16 %v81_v2, %v77_v1  ;;  %v80_v7 = vld [vmem:[%s5527_s4 + $0x20] sm:$0xff]  ;;  %v3311_v8 = vpack.c.bf16 %v83_v5, %v79_v3  ;;  %v78_v10 = vld [vmem:[%s5527_s4 + $0x10] sm:$0xff]  ;;  %v85_v12 = vld [vmem:[%s5527_s4 + $0x48] sm:$0xff]  ;;  %vm636_vm2 = vcmask 523264   ;;  %vm1758_vm3 = vcmask 64512  }
  0x18   :  { %v3281_v9 = vpack.c.bf16 %v80_v7, %v76_v6  ;;  %v82_v11 = vld [vmem:[%s5527_s4 + $0x30] sm:$0xff]  ;;  %v89_v14 = vld [vmem:[%s5527_s4 + $0x68] sm:$0xff]  ;;  %v87_v15 = vld [vmem:[%s5527_s4 + $0x58] sm:$0xff] }
  0x19   :  { %3280 = vmatprep.subr.bf16.mxu0 %v3279_v4  ;;  %v3313_v13 = vpack.c.bf16 %v82_v11, %v78_v10  ;;  %v91_v16 = vld [vmem:[%s5527_s4 + $0x78] sm:$0xff]  ;;  %3312 = vmatprep.subr.bf16.mxu1 %v3311_v8  ;;  %v3283_v17 = vpack.c.bf16 %v89_v14, %v85_v12  ;;  %v84_v19 = vld [vmem:[%s5527_s4 + $0x40] sm:$0xff]  ;;  %v86_v21 = vld [vmem:[%s5527_s4 + $0x50] sm:$0xff] }
  0x1a   :  { %3282 = vmatpush1.bf16.msra.mxu0 %v3281_v9  ;;  %v3315_v18 = vpack.c.bf16 %v91_v16, %v87_v15  ;;  %v88_v20 = vld [vmem:[%s5527_s4 + $0x60] sm:$0xff]  ;;  %v90_v23 = vld [vmem:[%s5527_s4 + $0x70] sm:$0xff]  ;;  %v93_v24 = vld [vmem:[%s5527_s4 + $0x88] sm:$0xff] }
  0x1b   :  { %3314 = vmatpush1.bf16.msra.mxu1 %v3313_v13  ;;  %v3285_v22 = vpack.c.bf16 %v88_v20, %v84_v19  ;;  %v97_v25 = vld [vmem:[%s5527_s4 + $0xa8] sm:$0xff]  ;;  %3284 = vmatprep.subr.bf16.mxu0 %v3283_v17  ;;  %v3317_v26 = vpack.c.bf16 %v90_v23, %v86_v21  ;;  %v95_v28 = vld [vmem:[%s5527_s4 + $0x98] sm:$0xff]  ;;  %v92_v30 = vld [vmem:[%s5527_s4 + $0x80] sm:$0xff] }
  0x1c   :  { %3316 = vmatprep.subr.bf16.mxu1 %v3315_v18  ;;  %v3287_v27 = vpack.c.bf16 %v97_v25, %v93_v24  ;;  %v99_v29 = vld [vmem:[%s5527_s4 + $0xb8] sm:$0xff]  ;;  %v96_v32 = vld [vmem:[%s5527_s4 + $0xa0] sm:$0xff]  ;;  %v94_v33 = vld [vmem:[%s5527_s4 + $0x90] sm:$0xff] }
  0x1d   :  { %v3319_v31 = vpack.c.bf16 %v99_v29, %v95_v28  ;;  %v98_v34 = vld [vmem:[%s5527_s4 + $0xb0] sm:$0xff]  ;;  %v3289_v35 = vpack.c.bf16 %v96_v32, %v92_v30  ;;  %v101_v36 = vld [vmem:[%s5527_s4 + $0xc8] sm:$0xff]  ;;  %v103_v38 = vld [vmem:[%s5527_s4 + $0xd8] sm:$0xff] }
  0x1e   :  { %3286 = vmatpush1.bf16.msra.mxu0 %v3285_v22  ;;  %v105_v37 = vld [vmem:[%s5527_s4 + $0xe8] sm:$0xff]  ;;  %v3321_v39 = vpack.c.bf16 %v98_v34, %v94_v33  ;;  %v107_v41 = vld [vmem:[%s5527_s4 + $0xf8] sm:$0xff]  ;;  %v100_v42 = vld [vmem:[%s5527_s4 + $0xc0] sm:$0xff] }
  0x1f   :  { %3318 = vmatpush1.bf16.msra.mxu1 %v3317_v26  ;;  %3288 = vmatprep.subr.bf16.mxu0 %v3287_v27  ;;  %v3291_v40 = vpack.c.bf16 %v105_v37, %v101_v36  ;;  %v104_v43 = vld [vmem:[%s5527_s4 + $0xe0] sm:$0xff]  ;;  %v3323_v44 = vpack.c.bf16 %v107_v41, %v103_v38  ;;  %v102_v45 = vld [vmem:[%s5527_s4 + $0xd0] sm:$0xff]  ;;  %v109_v47 = vld [vmem:[%s5527_s4 + $0x108] sm:$0xff] }
  0x20   :  { %3320 = vmatprep.subr.bf16.mxu1 %v3319_v31  ;;  %v106_v46 = vld [vmem:[%s5527_s4 + $0xf0] sm:$0xff]  ;;  %v113_v48 = vld [vmem:[%s5527_s4 + $0x128] sm:$0xff]  ;;  %v111_v49 = vld [vmem:[%s5527_s4 + $0x118] sm:$0xff]  ;;  %v3293_v51 = vpack.c.bf16 %v104_v43, %v100_v42 }
  0x21   :  { %v115_v50 = vld [vmem:[%s5527_s4 + $0x138] sm:$0xff]  ;;  %v3325_v52 = vpack.c.bf16 %v106_v46, %v102_v45  ;;  %v3295_v53 = vpack.c.bf16 %v113_v48, %v109_v47  ;;  %v108_v54 = vld [vmem:[%s5527_s4 + $0x100] sm:$0xff]  ;;  %v110_v56 = vld [vmem:[%s5527_s4 + $0x110] sm:$0xff]  ;;  %v3657_v47 = vmov 0.0|0.0  }
  0x22   :  { %3290 = vmatpush1.bf16.msra.mxu0 %v3289_v35  ;;  %v112_v55 = vld [vmem:[%s5527_s4 + $0x120] sm:$0xff]  ;;  %v3327_v57 = vpack.c.bf16 %v115_v50, %v111_v49  ;;  %v114_v58 = vld [vmem:[%s5527_s4 + $0x130] sm:$0xff]  ;;  %v117_v59 = vld [vmem:[%s5527_s4 + $0x148] sm:$0xff] }
  0x23   :  { %3322 = vmatpush1.bf16.msra.mxu1 %v3321_v39  ;;  %3292 = vmatprep.subr.bf16.mxu0 %v3291_v40  ;;  %v121_v60 = vld [vmem:[%s5527_s4 + $0x168] sm:$0xff]  ;;  %v119_v61 = vld [vmem:[%s5527_s4 + $0x158] sm:$0xff]  ;;  %v3297_v63 = vpack.c.bf16 %v112_v55, %v108_v54  ;;  %v3329_v1 = vpack.c.bf16 %v114_v58, %v110_v56  ;;  %v116_v3 = vld [vmem:[%s5527_s4 + $0x140] sm:$0xff] }
  0x24   :  { %3324 = vmatprep.subr.bf16.mxu1 %v3323_v44  ;;  %v123_v62 = vld [vmem:[%s5527_s4 + $0x178] sm:$0xff]  ;;  %v3299_v2 = vpack.c.bf16 %v121_v60, %v117_v59  ;;  %v120_v4 = vld [vmem:[%s5527_s4 + $0x160] sm:$0xff]  ;;  %v118_v5 = vld [vmem:[%s5527_s4 + $0x150] sm:$0xff] }
  0x25   :  { %v3331_v6 = vpack.c.bf16 %v123_v62, %v119_v61  ;;  %v122_v7 = vld [vmem:[%s5527_s4 + $0x170] sm:$0xff]  ;;  %v125_v8 = vld [vmem:[%s5527_s4 + $0x188] sm:$0xff]  ;;  %v127_v10 = vld [vmem:[%s5527_s4 + $0x198] sm:$0xff]  ;;  %v3301_v12 = vpack.c.bf16 %v120_v4, %v116_v3 }
  0x26   :  { %3294 = vmatpush1.bf16.msra.mxu0 %v3293_v51  ;;  %v129_v9 = vld [vmem:[%s5527_s4 + $0x1a8] sm:$0xff]  ;;  %v131_v11 = vld [vmem:[%s5527_s4 + $0x1b8] sm:$0xff]  ;;  %v3333_v13 = vpack.c.bf16 %v122_v7, %v118_v5  ;;  %v124_v15 = vld [vmem:[%s5527_s4 + $0x180] sm:$0xff] }
  0x27   :  { %3326 = vmatpush1.bf16.msra.mxu1 %v3325_v52  ;;  %3296 = vmatprep.subr.bf16.mxu0 %v3295_v53  ;;  %v3303_v14 = vpack.c.bf16 %v129_v9, %v125_v8  ;;  %v128_v16 = vld [vmem:[%s5527_s4 + $0x1a0] sm:$0xff]  ;;  %v126_v17 = vld [vmem:[%s5527_s4 + $0x190] sm:$0xff]  ;;  %v3335_v18 = vpack.c.bf16 %v131_v11, %v127_v10  ;;  %v133_v20 = vld [vmem:[%s5527_s4 + $0x1c8] sm:$0xff] }
  0x28   :  { %3328 = vmatprep.subr.bf16.mxu1 %v3327_v57  ;;  %v130_v19 = vld [vmem:[%s5527_s4 + $0x1b0] sm:$0xff]  ;;  %v137_v21 = vld [vmem:[%s5527_s4 + $0x1e8] sm:$0xff]  ;;  %v135_v22 = vld [vmem:[%s5527_s4 + $0x1d8] sm:$0xff]  ;;  %v3305_v24 = vpack.c.bf16 %v128_v16, %v124_v15 }
  0x29   :  { %v139_v23 = vld [vmem:[%s5527_s4 + $0x1f8] sm:$0xff]  ;;  %v3337_v25 = vpack.c.bf16 %v130_v19, %v126_v17  ;;  %v3307_v26 = vpack.c.bf16 %v137_v21, %v133_v20  ;;  %v132_v27 = vld [vmem:[%s5527_s4 + $0x1c0] sm:$0xff]  ;;  %v134_v29 = vld [vmem:[%s5527_s4 + $0x1d0] sm:$0xff] }
  0x2a   :  { %3298 = vmatpush1.bf16.msra.mxu0 %v3297_v63  ;;  %v136_v28 = vld [vmem:[%s5527_s4 + $0x1e0] sm:$0xff]  ;;  %v3339_v30 = vpack.c.bf16 %v139_v23, %v135_v22  ;;  %v138_v31 = vld [vmem:[%s5527_s4 + $0x1f0] sm:$0xff]  ;;  %v69_v32 = vld [vmem:[%s5526_s3 + $0x8] sm:$0xff] }
  0x2b   :  { %3330 = vmatpush1.bf16.msra.mxu1 %v3329_v1  ;;  %3300 = vmatprep.subr.bf16.mxu0 %v3299_v2  ;;  %v73_v33 = vld [vmem:[%s5526_s3 + $0x28] sm:$0xff]  ;;  %v71_v34 = vld [vmem:[%s5526_s3 + $0x18] sm:$0xff]  ;;  %v3309_v36 = vpack.c.bf16 %v136_v28, %v132_v27  ;;  %v3341_v37 = vpack.c.bf16 %v138_v31, %v134_v29  ;;  %v68_v39 = vld [vmem:[%s5526_s3] sm:$0xff] }
  0x2c   :  { %3332 = vmatprep.subr.bf16.mxu1 %v3331_v6  ;;  %v75_v35 = vld [vmem:[%s5526_s3 + $0x38] sm:$0xff]  ;;  %v3343_v38 = vpack.c.bf16 %v73_v33, %v69_v32  ;;  %v72_v40 = vld [vmem:[%s5526_s3 + $0x20] sm:$0xff]  ;;  %v70_v42 = vld [vmem:[%s5526_s3 + $0x10] sm:$0xff] }
  0x2d   :  { %v3347_v41 = vpack.c.bf16 %v75_v35, %v71_v34  ;;  %v74_v43 = vld [vmem:[%s5526_s3 + $0x30] sm:$0xff]  ;;  %v66_v44 = vld [vmem:[%s5564_s24] sm:$0xff]  ;;  %v3345_v45 = vpack.c.bf16 %v72_v40, %v68_v39  ;;  %v625_v49 = vld [vmem:[%s5533_s10 + $0x8] sm:$0xff] }
  0x2e   :  { %3302 = vmatpush1.bf16.msra.mxu0 %v3301_v12  ;;  %v3349_v46 = vpack.c.bf16 %v74_v43, %v70_v42  ;;  %v624_v48 = vld [vmem:[%s5533_s10] sm:$0xff]  ;;  %v626_v52 = vld [vmem:[%s5533_s10 + $0x10] sm:$0xff]  ;;  %v627_v53 = vld [vmem:[%s5533_s10 + $0x18] sm:$0xff] }
  0x2f   :  { %3334 = vmatpush1.bf16.msra.mxu1 %v3333_v13  ;;  %3304 = vmatprep.subr.bf16.mxu0 %v3303_v14  ;;  %v65_v50 = vld [vmem:[%s5565_s25] sm:$0xff]  ;;  %v3376_v51 = vpack.c.bf16 %v625_v49, %v624_v48  ;;  %v3379_v54 = vpack.c.bf16 %v627_v53, %v626_v52  ;;  %v629_v56 = vld [vmem:[%s5533_s10 + $0x28] sm:$0xff]  ;;  %v630_v58 = vld [vmem:[%s5533_s10 + $0x30] sm:$0xff] }
  0x30   :  { %3336 = vmatprep.subr.bf16.mxu1 %v3335_v18  ;;  %v628_v55 = vld [vmem:[%s5533_s10 + $0x20] sm:$0xff]  ;;  %v631_v59 = vld [vmem:[%s5533_s10 + $0x38] sm:$0xff]  ;;  %v576_v62 = vld [vmem:[%s5529_s6 + $0x8] sm:$0xff] }
  0x31   :  { %v3382_v57 = vpack.c.bf16 %v629_v56, %v628_v55  ;;  %v3385_v60 = vpack.c.bf16 %v631_v59, %v630_v58  ;;  %v575_v61 = vld [vmem:[%s5529_s6] sm:$0xff]  ;;  %v577_v63 = vld [vmem:[%s5529_s6 + $0x10] sm:$0xff]  ;;  %v578_v1 = vld [vmem:[%s5529_s6 + $0x18] sm:$0xff] }
  0x32   :  { %3306 = vmatpush1.bf16.msra.mxu0 %v3305_v24  ;;  %v579_v2 = vld [vmem:[%s5529_s6 + $0x20] sm:$0xff]  ;;  %v580_v3 = vld [vmem:[%s5529_s6 + $0x28] sm:$0xff]  ;;  %v581_v4 = vld [vmem:[%s5529_s6 + $0x30] sm:$0xff] }
  0x33   :  { %3338 = vmatpush1.bf16.msra.mxu1 %v3337_v25  ;;  %3308 = vmatprep.subr.bf16.mxu0 %v3307_v26  ;;  %v582_v5 = vld [vmem:[%s5529_s6 + $0x38] sm:$0xff]  ;;  %v583_v6 = vld [vmem:[%s5529_s6 + $0x40] sm:$0xff]  ;;  %v584_v7 = vld [vmem:[%s5529_s6 + $0x48] sm:$0xff] }
  0x34   :  { %3340 = vmatprep.subr.bf16.mxu1 %v3339_v30  ;;  %v585_v8 = vld [vmem:[%s5529_s6 + $0x50] sm:$0xff]  ;;  %v586_v9 = vld [vmem:[%s5529_s6 + $0x58] sm:$0xff]  ;;  %v587_v10 = vld [vmem:[%s5529_s6 + $0x60] sm:$0xff] }
  0x35   :  { %v588_v11 = vld [vmem:[%s5529_s6 + $0x68] sm:$0xff]  ;;  %v589_v12 = vld [vmem:[%s5529_s6 + $0x70] sm:$0xff]  ;;  %v590_v13 = vld [vmem:[%s5529_s6 + $0x78] sm:$0xff] }
  0x36   :  { %3310 = vmatpush1.bf16.msra.mxu0 %v3309_v36  ;;  %v591_v14 = vld [vmem:[%s5529_s6 + $0x80] sm:$0xff]  ;;  %v592_v15 = vld [vmem:[%s5529_s6 + $0x88] sm:$0xff]  ;;  %v593_v16 = vld [vmem:[%s5529_s6 + $0x90] sm:$0xff] }
  0x37   :  { %3342 = vmatpush1.bf16.msra.mxu1 %v3341_v37  ;;  %3344 = vmatprep.subr.bf16.mxu0 %v3343_v38  ;;  %v594_v17 = vld [vmem:[%s5529_s6 + $0x98] sm:$0xff]  ;;  %v595_v18 = vld [vmem:[%s5529_s6 + $0xa0] sm:$0xff]  ;;  %v596_v19 = vld [vmem:[%s5529_s6 + $0xa8] sm:$0xff] }
  0x38   :  { %3348 = vmatprep.subr.bf16.mxu1 %v3347_v41  ;;  %v484_v20 = vld [vmem:[%s5532_s9] sm:$0xff]  ;;  %v485_v21 = vld [vmem:[%s5532_s9 + $0x8] sm:$0xff]  ;;  %v597_v23 = vld [vmem:[%s5529_s6 + $0xb0] sm:$0xff] }
  0x39   :  { %206 = vmatmul.mubr.f32.vlgmr.msra.gmra.mrb[0].mxu0 %v66_v44  ;;  %v3352_v22 = vpack.c.bf16 %v485_v21, %v484_v20  ;;  %v486_v24 = vld [vmem:[%s5532_s9 + $0x10] sm:$0xff]  ;;  %v487_v25 = vld [vmem:[%s5532_s9 + $0x18] sm:$0xff]  ;;  %v488_v28 = vld [vmem:[%s5532_s9 + $0x20] sm:$0xff] }
  0x3a   :  { %277 = vmatmul.mubr.f32.vlgmr.msra.gmra.mrb[0].mxu1 %v66_v44  ;;  %3346 = vmatpush1.bf16.msra.mxu0 %v3345_v45  ;;  %v3355_v26 = vpack.c.bf16 %v487_v25, %v486_v24  ;;  %v598_v27 = vld [vmem:[%s5529_s6 + $0xb8] sm:$0xff]  ;;  %v489_v29 = vld [vmem:[%s5532_s9 + $0x28] sm:$0xff]  ;;  %v599_v31 = vld [vmem:[%s5529_s6 + $0xc0] sm:$0xff] }
  0x3b   :  { %3350 = vmatpush1.bf16.msra.mxu1 %v3349_v46  ;;  %351 = vmatprep.mubr.f32.mxu0 %v3656_v0  ;;  %v3358_v30 = vpack.c.bf16 %v489_v29, %v488_v28  ;;  %v490_v32 = vld [vmem:[%s5532_s9 + $0x30] sm:$0xff]  ;;  %v491_v33 = vld [vmem:[%s5532_s9 + $0x38] sm:$0xff]  ;;  %v600_v35 = vld [vmem:[%s5529_s6 + $0xc8] sm:$0xff] }
  0x3c   :  { %422 = vmatprep.mubr.f32.mxu1 %v3656_v0  ;;  %3375 = vmatprep.subr.bf16.mxu1 %v3657_v47  ;;  %v3361_v34 = vpack.c.bf16 %v491_v33, %v490_v32  ;;  %v492_v36 = vld [vmem:[%s5532_s9 + $0x40] sm:$0xff]  ;;  %v493_v37 = vld [vmem:[%s5532_s9 + $0x48] sm:$0xff]  ;;  %v601_v39 = vld [vmem:[%s5529_s6 + $0xd0] sm:$0xff] }
  0x3d   :  { %3351 = vmatprep.subr.bf16.mxu0 %v3657_v47  ;;  %v3364_v38 = vpack.c.bf16 %v493_v37, %v492_v36  ;;  %v494_v40 = vld [vmem:[%s5532_s9 + $0x50] sm:$0xff]  ;;  %v495_v41 = vld [vmem:[%s5532_s9 + $0x58] sm:$0xff]  ;;  %v496_v44 = vld [vmem:[%s5532_s9 + $0x60] sm:$0xff] }
  0x3e   :  { %v3367_v42 = vpack.c.bf16 %v495_v41, %v494_v40  ;;  %v602_v43 = vld [vmem:[%s5529_s6 + $0xd8] sm:$0xff]  ;;  %v497_v45 = vld [vmem:[%s5532_s9 + $0x68] sm:$0xff]  ;;  %v603_v48 = vld [vmem:[%s5529_s6 + $0xe0] sm:$0xff] }
  0x3f   :  { %v3370_v46 = vpack.c.bf16 %v497_v45, %v496_v44  ;;  %v498_v49 = vld [vmem:[%s5532_s9 + $0x70] sm:$0xff]  ;;  %v604_v52 = vld [vmem:[%s5529_s6 + $0xe8] sm:$0xff]  ;;  %v607_v55 = vld [vmem:[%s5529_s6 + $0x100] sm:$0xff] }
  0x40   :  { %v605_v53 = vld [vmem:[%s5529_s6 + $0xf0] sm:$0xff]  ;;  %v608_v56 = vld [vmem:[%s5529_s6 + $0x108] sm:$0xff]  ;;  %v610_v58 = vld [vmem:[%s5529_s6 + $0x118] sm:$0xff] }
  0x41   :  { %2476 = vmatmul.mubr.msk.f32.vlgmr.msra.gmra.mrb[0].mxu0 %vm283_vm0, %v65_v50  ;;  %v611_v59 = vld [vmem:[%s5529_s6 + $0x120] sm:$0xff] }
  0x42   :  { %2477 = vmatmul.mubr.msk.f32.vlgmr.msra.gmra.mrb[0].mxu1 %vm283_vm0, %v65_v50  ;;  %2915 = vmatprep.mubr.msk.f32.mxu0 %vm3658_vm1, %v3656_v0  ;;  %v499_v50 = vld [vmem:[%s5532_s9 + $0x78] sm:$0xff] }
  0x43   :  { %3377 = vmatpush3.bf16.msra.mxu1 %v3376_v51  ;;  %2934 = vmatprep.mubr.msk.f32.mxu1 %vm3658_vm1, %v3656_v0  ;;  %v3373_v51 = vpack.c.bf16 %v499_v50, %v498_v49 }
  0x44   :  { %3378 = vmatprep.subr.bf16.mxu1 %v3657_v47  ;;  %3353 = vmatpush3.bf16.msra.mxu0 %v3352_v22 }
  0x45   :  { %3354 = vmatprep.subr.bf16.mxu0 %v3657_v47 }
  0x47   :  { %3380 = vmatpush3.bf16.msra.mxu1 %v3379_v54  ;;  %v606_v54 = vld [vmem:[%s5529_s6 + $0xf8] sm:$0xff] }
  0x48   :  { %3381 = vmatprep.subr.bf16.mxu1 %v3657_v47  ;;  %3356 = vmatpush3.bf16.msra.mxu0 %v3355_v26 }
  0x49   :  { %3357 = vmatprep.subr.bf16.mxu0 %v3657_v47 }
  0x4b   :  { %3383 = vmatpush3.bf16.msra.mxu1 %v3382_v57  ;;  %v609_v57 = vld [vmem:[%s5529_s6 + $0x110] sm:$0xff] }
  0x4c   :  { %3384 = vmatprep.subr.bf16.mxu1 %v3657_v47  ;;  %3359 = vmatpush3.bf16.msra.mxu0 %v3358_v30 }
  0x4d   :  { %3360 = vmatprep.subr.bf16.mxu0 %v3657_v47 }
  0x4f   :  { %3386 = vmatpush3.bf16.msra.mxu1 %v3385_v60  ;;  %v612_v60 = vld [vmem:[%s5529_s6 + $0x128] sm:$0xff] }
  0x50   :  { %3362 = vmatpush3.bf16.msra.mxu0 %v3361_v34 }
  0x51   :  { %3363 = vmatprep.subr.bf16.mxu0 %v3657_v47 }
  0x52   :  { %2935 = vmatmul.mubr.msk.f32.vlgmr.msra.gmra.mrb[2].mxu1 %vm636_vm2, %v575_v61  ;;  %v613_v61 = vld [vmem:[%s5529_s6 + $0x130] sm:$0xff] }
  0x53   :  { %2937 = vmatprep.mubr.msk.f32.mxu1 %vm3658_vm1, %v3656_v0 }
  0x54   :  { %3365 = vmatpush3.bf16.msra.mxu0 %v3364_v38 }
  0x55   :  { %3366 = vmatprep.subr.bf16.mxu0 %v3657_v47 }
  0x56   :  { %2938 = vmatmul.mubr.msk.f32.gmra.mrb[4].mxu1 %vm636_vm2, %v576_v62  ;;  %v614_v62 = vld [vmem:[%s5529_s6 + $0x138] sm:$0xff] }
  0x57   :  { %2940 = vmatprep.mubr.msk.f32.mxu1 %vm3658_vm1, %v3656_v0 }
  0x58   :  { %3368 = vmatpush3.bf16.msra.mxu0 %v3367_v42 }
  0x59   :  { %3369 = vmatprep.subr.bf16.mxu0 %v3657_v47 }
  0x5a   :  { %2941 = vmatmul.mubr.msk.f32.gmra.mrb[6].mxu1 %vm636_vm2, %v577_v63  ;;  %v615_v63 = vld [vmem:[%s5529_s6 + $0x140] sm:$0xff] }
  0x5b   :  { %2943 = vmatprep.mubr.msk.f32.mxu1 %vm3658_vm1, %v3656_v0 }
  0x5c   :  { %3371 = vmatpush3.bf16.msra.mxu0 %v3370_v46 }
  0x5d   :  { %3372 = vmatprep.subr.bf16.mxu0 %v3657_v47 }
  0x5e   :  { %2944 = vmatmul.mubr.msk.f32.gmra.mrb[8].mxu1 %vm636_vm2, %v578_v1  ;;  %v616_v1 = vld [vmem:[%s5529_s6 + $0x148] sm:$0xff] }
  0x5f   :  { %2946 = vmatprep.mubr.msk.f32.mxu1 %vm3658_vm1, %v3656_v0 }
  0x60   :  { %3374 = vmatpush3.bf16.msra.mxu0 %v3373_v51 }
  0x61   :  { %3387 = vmatprep.subr.bf16.mxu0 %v3657_v47 }
  0x62   :  { %2947 = vmatmul.mubr.msk.f32.gmra.mrb[10].mxu1 %vm636_vm2, %v579_v2  ;;  %v617_v2 = vld [vmem:[%s5529_s6 + $0x150] sm:$0xff] }
  0x63   :  { %2949 = vmatprep.mubr.msk.f32.mxu1 %vm3658_vm1, %v3656_v0 }
  0x66   :  { %2950 = vmatmul.mubr.msk.f32.gmra.mrb[12].mxu1 %vm636_vm2, %v580_v3  ;;  %v618_v3 = vld [vmem:[%s5529_s6 + $0x158] sm:$0xff] }
  0x67   :  { %2952 = vmatprep.mubr.msk.f32.mxu1 %vm3658_vm1, %v3656_v0 }
  0x6a   :  { %2953 = vmatmul.mubr.msk.f32.gmra.mrb[14].mxu1 %vm636_vm2, %v581_v4  ;;  %v619_v4 = vld [vmem:[%s5529_s6 + $0x160] sm:$0xff] }
  0x6b   :  { %2955 = vmatprep.mubr.msk.f32.mxu1 %vm3658_vm1, %v3656_v0 }
  0x6e   :  { %2956 = vmatmul.mubr.msk.f32.gmra.mrb[16].mxu1 %vm636_vm2, %v582_v5  ;;  %v620_v5 = vld [vmem:[%s5529_s6 + $0x168] sm:$0xff] }
  0x6f   :  { %2958 = vmatprep.mubr.msk.f32.mxu1 %vm3658_vm1, %v3656_v0 }
  0x72   :  { %2959 = vmatmul.mubr.msk.f32.gmra.mrb[18].mxu1 %vm636_vm2, %v583_v6  ;;  %v430_v6 = vlaneseq }
  0x73   :  { %2961 = vmatprep.mubr.msk.f32.mxu1 %vm3658_vm1, %v3656_v0 }
  0x76   :  { %2962 = vmatmul.mubr.msk.f32.gmra.mrb[20].mxu1 %vm636_vm2, %v584_v7  ;;  %v621_v7 = vld [vmem:[%s5529_s6 + $0x170] sm:$0xff] }
  0x77   :  { %2964 = vmatprep.mubr.msk.f32.mxu1 %vm3658_vm1, %v3656_v0 }
  0x7a   :  { %2965 = vmatmul.mubr.msk.f32.gmra.mrb[22].mxu1 %vm636_vm2, %v585_v8  ;;  %v4358_v8 = vshrl.u32 %v430_v6, 7 }
  0x7b   :  { %2967 = vmatprep.mubr.msk.f32.mxu1 %vm3658_vm1, %v3656_v0 }
  0x7c   :  { %v440_v29 = vsub.s32 2, %v4358_v8 }
  0x7e   :  { %2968 = vmatmul.mubr.msk.f32.gmra.mrb[24].mxu1 %vm636_vm2, %v586_v9  ;;  %v622_v9 = vld [vmem:[%s5529_s6 + $0x178] sm:$0xff] }
  0x7f   :  { %2970 = vmatprep.mubr.msk.f32.mxu1 %vm3658_vm1, %v3656_v0 }
  0x82   :  { %2971 = vmatmul.mubr.msk.f32.gmra.mrb[26].mxu1 %vm636_vm2, %v587_v10  ;;  %v432_v10 = vsub.s32 0, %v4358_v8 }
  0x83   :  { %2973 = vmatprep.mubr.msk.f32.mxu1 %vm3658_vm1, %v3656_v0 }
  0x86   :  { %2974 = vmatmul.mubr.msk.f32.gmra.mrb[28].mxu1 %vm636_vm2, %v588_v11  ;;  %v140_v11 = vld [vmem:[%s5528_s5] sm:$0xf] }
  0x87   :  { %2976 = vmatprep.mubr.msk.f32.mxu1 %vm3658_vm1, %v3656_v0 }
  0x8a   :  { %2977 = vmatmul.mubr.msk.f32.gmra.mrb[30].mxu1 %vm636_vm2, %v589_v12  ;;  %v436_v12 = vsub.s32 1, %v4358_v8 }
  0x8b   :  { %2979 = vmatprep.mubr.msk.f32.mxu1 %vm3658_vm1, %v3656_v0 }
  0x8e   :  { %2980 = vmatmul.mubr.msk.f32.gmra.mrb[32].mxu1 %vm636_vm2, %v590_v13  ;;  %v623_v13 = vld [vmem:[%s5529_s6 + $0x180] sm:$0xff] }
  0x8f   :  { %2982 = vmatprep.mubr.msk.f32.mxu1 %vm3658_vm1, %v3656_v0 }
  0x92   :  { %2983 = vmatmul.mubr.msk.f32.gmra.mrb[34].mxu1 %vm636_vm2, %v591_v14  ;;  %v433_v14 = vrot.slane %v140_v11, %v432_v10 }
  0x93   :  { %2985 = vmatprep.mubr.msk.f32.mxu1 %vm3658_vm1, %v3656_v0 }
  0x96   :  { %2986 = vmatmul.mubr.msk.f32.gmra.mrb[36].mxu1 %vm636_vm2, %v592_v15  ;;  %v437_v15 = vrot.slane %v140_v11, %v436_v12  ;;  %v1144_v12 = vld [vmem:[#allocation2 + $0x8] sm:$0xff] }
  0x97   :  { %2988 = vmatprep.mubr.msk.f32.mxu1 %vm3658_vm1, %v3656_v0 }
  0x9a   :  { %2989 = vmatmul.mubr.msk.f32.gmra.mrb[38].mxu1 %vm636_vm2, %v593_v16  ;;  %v444_v16 = vsub.s32 3, %v4358_v8 }
  0x9b   :  { %2991 = vmatprep.mubr.msk.f32.mxu1 %vm3658_vm1, %v3656_v0 }
  0x9e   :  { %2992 = vmatmul.mubr.msk.f32.gmra.mrb[40].mxu1 %vm636_vm2, %v594_v17 }
  0x9f   :  { %2994 = vmatprep.mubr.msk.f32.mxu1 %vm3658_vm1, %v3656_v0 }
  0xa2   :  { %2995 = vmatmul.mubr.msk.f32.gmra.mrb[42].mxu1 %vm636_vm2, %v595_v18 }
  0xa3   :  { %2997 = vmatprep.mubr.msk.f32.mxu1 %vm3658_vm1, %v3656_v0 }
  0xa6   :  { %2998 = vmatmul.mubr.msk.f32.gmra.mrb[44].mxu1 %vm636_vm2, %v596_v19 }
  0xa7   :  { %3000 = vmatprep.mubr.msk.f32.mxu1 %vm3658_vm1, %v3656_v0 }
  0xaa   :  { %3001 = vmatmul.mubr.msk.f32.gmra.mrb[46].mxu1 %vm636_vm2, %v597_v23  ;;  %v445_v23 = vrot.slane %v140_v11, %v444_v16 }
  0xab   :  { %3003 = vmatprep.mubr.msk.f32.mxu1 %vm3658_vm1, %v3656_v0 }
  0xae   :  { %3004 = vmatmul.mubr.msk.f32.gmra.mrb[48].mxu1 %vm636_vm2, %v598_v27 }
  0xaf   :  { %3006 = vmatprep.mubr.msk.f32.mxu1 %vm3658_vm1, %v3656_v0 }
  0xb2   :  { %3007 = vmatmul.mubr.msk.f32.gmra.mrb[50].mxu1 %vm636_vm2, %v599_v31  ;;  %v441_v31 = vrot.slane %v140_v11, %v440_v29  ;;  %v1143_v11 = vld [vmem:[#allocation2] sm:$0xff] }
  0xb3   :  { %3009 = vmatprep.mubr.msk.f32.mxu1 %vm3658_vm1, %v3656_v0 }
  0xb6   :  { %3010 = vmatmul.mubr.msk.f32.gmra.mrb[52].mxu1 %vm636_vm2, %v600_v35  ;;  %v4383_v35 = vld [vmem:[%s5536_s13 + $0x1] ss:$0 sm:$0xff] }
  0xb7   :  { %3012 = vmatprep.mubr.msk.f32.mxu1 %vm3658_vm1, %v3656_v0 }
  0xba   :  { %3013 = vmatmul.mubr.msk.f32.gmra.mrb[54].mxu1 %vm636_vm2, %v601_v39 }
  0xbb   :  { %3015 = vmatprep.mubr.msk.f32.mxu1 %vm3658_vm1, %v3656_v0 }
  0xbe   :  { %3016 = vmatmul.mubr.msk.f32.gmra.mrb[56].mxu1 %vm636_vm2, %v602_v43 }
  0xbf   :  { %3018 = vmatprep.mubr.msk.f32.mxu1 %vm3658_vm1, %v3656_v0 }
  0xc2   :  { %3019 = vmatmul.mubr.msk.f32.gmra.mrb[58].mxu1 %vm636_vm2, %v603_v48 }
  0xc3   :  { %3021 = vmatprep.mubr.msk.f32.mxu1 %vm3658_vm1, %v3656_v0 }
  0xc6   :  { %3022 = vmatmul.mubr.msk.f32.gmra.mrb[60].mxu1 %vm636_vm2, %v604_v52  ;;  %v67_v52 = vld [vmem:[%s5525_s2] sm:$0xff] }
  0xc7   :  { %3024 = vmatprep.mubr.msk.f32.mxu1 %vm3658_vm1, %v3656_v0 }
  0xca   :  { %3025 = vmatmul.mubr.msk.f32.gmra.mrb[62].mxu1 %vm636_vm2, %v605_v53 }
  0xcb   :  { %3027 = vmatprep.mubr.msk.f32.mxu1 %vm3658_vm1, %v3656_v0 }
  0xce   :  { %3028 = vmatmul.mubr.msk.f32.gmra.mrb[64].mxu1 %vm636_vm2, %v606_v54 }
  0xcf   :  { %3030 = vmatprep.mubr.msk.f32.mxu1 %vm3658_vm1, %v3656_v0 }
  0xd2   :  { %3031 = vmatmul.mubr.msk.f32.gmra.mrb[66].mxu1 %vm636_vm2, %v607_v55 }
  0xd3   :  { %3033 = vmatprep.mubr.msk.f32.mxu1 %vm3658_vm1, %v3656_v0 }
  0xd6   :  { %3034 = vmatmul.mubr.msk.f32.gmra.mrb[68].mxu1 %vm636_vm2, %v608_v56 }
  0xd7   :  { %3036 = vmatprep.mubr.msk.f32.mxu1 %vm3658_vm1, %v3656_v0 }
  0xda   :  { %3037 = vmatmul.mubr.msk.f32.gmra.mrb[70].mxu1 %vm636_vm2, %v609_v57 }
  0xdb   :  { %3039 = vmatprep.mubr.msk.f32.mxu1 %vm3658_vm1, %v3656_v0 }
  0xde   :  { %3040 = vmatmul.mubr.msk.f32.gmra.mrb[72].mxu1 %vm636_vm2, %v610_v58 }
  0xdf   :  { %3042 = vmatprep.mubr.msk.f32.mxu1 %vm3658_vm1, %v3656_v0 }
  0xe2   :  { %3043 = vmatmul.mubr.msk.f32.gmra.mrb[74].mxu1 %vm636_vm2, %v611_v59 }
  0xe3   :  { %3045 = vmatprep.mubr.msk.f32.mxu1 %vm3658_vm1, %v3656_v0 }
  0xe6   :  { %3046 = vmatmul.mubr.msk.f32.gmra.mrb[76].mxu1 %vm636_vm2, %v612_v60 }
  0xe7   :  { %3048 = vmatprep.mubr.msk.f32.mxu1 %vm3658_vm1, %v3656_v0 }
  0xea   :  { %3049 = vmatmul.mubr.msk.f32.gmra.mrb[78].mxu1 %vm636_vm2, %v613_v61 }
  0xeb   :  { %3051 = vmatprep.mubr.msk.f32.mxu1 %vm3658_vm1, %v3656_v0 }
  0xee   :  { %3052 = vmatmul.mubr.msk.f32.gmra.mrb[80].mxu1 %vm636_vm2, %v614_v62 }
  0xef   :  { %3054 = vmatprep.mubr.msk.f32.mxu1 %vm3658_vm1, %v3656_v0 }
  0xf2   :  { %3055 = vmatmul.mubr.msk.f32.gmra.mrb[82].mxu1 %vm636_vm2, %v615_v63 }
  0xf3   :  { %3057 = vmatprep.mubr.msk.f32.mxu1 %vm3658_vm1, %v3656_v0 }
  0xf6   :  { %3058 = vmatmul.mubr.msk.f32.gmra.mrb[84].mxu1 %vm636_vm2, %v616_v1 }
  0xf7   :  { %3060 = vmatprep.mubr.msk.f32.mxu1 %vm3658_vm1, %v3656_v0 }
  0xfa   :  { %3061 = vmatmul.mubr.msk.f32.gmra.mrb[86].mxu1 %vm636_vm2, %v617_v2 }
  0xfb   :  { %3063 = vmatprep.mubr.msk.f32.mxu1 %vm3658_vm1, %v3656_v0 }
  0xfe   :  { %3064 = vmatmul.mubr.msk.f32.gmra.mrb[88].mxu1 %vm636_vm2, %v618_v3 }
  0xff   :  { %3066 = vmatprep.mubr.msk.f32.mxu1 %vm3658_vm1, %v3656_v0 }
 0x102   :  { %3067 = vmatmul.mubr.msk.f32.gmra.mrb[90].mxu1 %vm636_vm2, %v619_v4 }
 0x103   :  { %3069 = vmatprep.mubr.msk.f32.mxu1 %vm3658_vm1, %v3656_v0 }
 0x106   :  { %3070 = vmatmul.mubr.msk.f32.gmra.mrb[92].mxu1 %vm636_vm2, %v620_v5 }
 0x107   :  { %3072 = vmatprep.mubr.msk.f32.mxu1 %vm3658_vm1, %v3656_v0 }
 0x10a   :  { %3073 = vmatmul.mubr.msk.f32.gmra.mrb[94].mxu1 %vm636_vm2, %v621_v7 }
 0x10b   :  { %3075 = vmatprep.mubr.msk.f32.mxu1 %vm3658_vm1, %v3656_v0 }
 0x10e   :  { %3076 = vmatmul.mubr.msk.f32.gmra.mrb[96].mxu1 %vm636_vm2, %v622_v9 }
 0x10f   :  { %3078 = vmatprep.mubr.msk.f32.mxu1 %vm3658_vm1, %v3656_v0 }
 0x112   :  { %3079 = vmatmul.mubr.msk.f32.gmra.mrb[98].mxu1 %vm636_vm2, %v623_v13 }
 0x114   :  { %v353_v17 = vpop.f32.mrb[0].mxu0 }
 0x115   :  { %v450_v18 = vadd.f32 %v433_v14, %v353_v17  ;;  %v424_v19 = vpop.f32.mrb[0].mxu1  ;;  %v355_v20 = vpop.f32.mrb[1].mxu0 }
 0x116   :  { %v451_v21 = vadd.f32 %v437_v15, %v355_v20  ;;  %v426_v22 = vpop.f32.mrb[1].mxu1  ;;  %v452_v33 = vadd.f32 %v441_v31, %v424_v19  ;;  %v3388_v19 = vpack.c.bf16 %v1144_v12, %v1143_v11  ;;  %v1098_v12 = vld [vmem:[%s5530_s7 + $0x20] sm:$0xff] }
 0x117   :  { %v454_v24 = vsub.f32 0.0, %v450_v18  ;;  %v453_v28 = vadd.f32 %v445_v23, %v426_v22  ;;  %v1146_v22 = vld [vmem:[#allocation2 + $0x18] sm:$0xff] }
 0x118   :  { %v460_v25 = vsub.f32 0.0, %v451_v21  ;;  %v1145_v21 = vld [vmem:[#allocation2 + $0x10] sm:$0xff] }
 0x119   :  { %v455_v26 = vmul.f32 1.442695, %v454_v24  ;;  %v467_v30 = vsub.f32 0.0, %v453_v28  ;;  %v1148_v28 = vld [vmem:[#allocation2 + $0x28] sm:$0xff] }
 0x11a   :  { %v461_v27 = vmul.f32 1.442695, %v460_v25 }
 0x11b   :  { %3603 = vpow2.f32 %v455_v26  ;;  %v468_v32 = vmul.f32 1.442695, %v467_v30  ;;  %v3391_v26 = vpack.c.bf16 %v1146_v22, %v1145_v21 }
 0x11c   :  { %3605 = vpow2.f32 %v461_v27  ;;  %v1147_v27 = vld [vmem:[#allocation2 + $0x20] sm:$0xff] }
 0x11d   :  { %3607 = vpow2.f32 %v468_v32 }
 0x11e   :  { %3609 = vtanh.f32 %v452_v33  ;;  %v3394_v33 = vpack.c.bf16 %v1148_v28, %v1147_v27  ;;  %v1101_v28 = vld [vmem:[%s5530_s7 + $0x38] sm:$0xff] }
 0x125   :  { %v3604_v34 = vpop.eup %3603  ;;  %v850_v36 = vpop.f32.mrb[2].mxu1 }
 0x126   :  { %v3606_v37 = vpop.eup %3605  ;;  %v457_v38 = vadd.f32 1.0, %v3604_v34  ;;  %v2936_v39 = vpop.f32.mrb[3].mxu1  ;;  %v4386_v41 = vadd.f32 %v4383_v35, %v850_v36  ;;  %v1149_v34 = vld [vmem:[#allocation2 + $0x30] sm:$0xff]  ;;  %v1150_v36 = vld [vmem:[#allocation2 + $0x38] sm:$0xff] }
 0x127   :  { %v463_v40 = vadd.f32 1.0, %v3606_v37  ;;  %v3608_v49 = vpop.eup %3607 }
 0x128   :  { %3611 = vrcp.f32 %v457_v38  ;;  %v3610_v51 = vpop.eup %3609  ;;  %v470_v59 = vadd.f32 1.0, %v3608_v49  ;;  %v1094_v49 = vld [vmem:[%s5530_s7] sm:$0xff] }
 0x129   :  { %3613 = vrcp.f32 %v463_v40  ;;  %v855_v42 = vpop.f32.mrb[4].mxu1  ;;  %v3397_v40 = vpack.c.bf16 %v1150_v36, %v1149_v34  ;;  %v1102_v36 = vld [vmem:[%s5530_s7 + $0x40] sm:$0xff] }
 0x12a   :  { %v4389_v43 = vadd.f32 %v4383_v35, %v855_v42  ;;  %v2939_v44 = vpop.f32.mrb[5].mxu1  ;;  %3615 = vrcp.f32 %v470_v59 }
 0x12c   :  { %v3401_v45 = vpack.c.bf16 %v4389_v43, %v4386_v41  ;;  %v1103_v43 = vld [vmem:[%s5530_s7 + $0x48] sm:$0xff] }
 0x12d   :  { %v860_v46 = vpop.f32.mrb[6].mxu1 }
 0x12e   :  { %v2942_v48 = vpop.f32.mrb[7].mxu1  ;;  %v4394_v50 = vadd.f32 %v4383_v35, %v860_v46 }
 0x131   :  { %v865_v53 = vpop.f32.mrb[8].mxu1 }
 0x132   :  { %v3612_v54 = vpop.eup %3611  ;;  %v4400_v55 = vadd.f32 %v4383_v35, %v865_v53  ;;  %v2945_v56 = vpop.f32.mrb[9].mxu1 }
 0x133   :  { %v3614_v57 = vpop.eup %3613  ;;  %v474_v58 = vmul.f32 %v3612_v54, %v3610_v51  ;;  %v1095_v54 = vld [vmem:[%s5530_s7 + $0x8] sm:$0xff] }
 0x134   :  { %v473_v60 = vmul.f32 %v3614_v57, %v67_v52  ;;  %v3405_v61 = vpack.c.bf16 %v4400_v55, %v4394_v50  ;;  %v3616_v14 = vpop.eup %3615  ;;  %v1105_v55 = vld [vmem:[%s5530_s7 + $0x58] sm:$0xff] }
 0x135   :  { %v870_v62 = vpop.f32.mrb[10].mxu1 }
 0x136   :  { %v475_v63 = vadd.f32 %v474_v58, %v473_v60  ;;  %v2948_v1 = vpop.f32.mrb[11].mxu1  ;;  %v4408_v2 = vadd.f32 %v4383_v35, %v870_v62  ;;  %v1096_v60 = vld [vmem:[%s5530_s7 + $0x10] sm:$0xff] }
 0x138   :  { %479 = vst [vmem:[%s5540_s17] sm:$0xff] %v475_v63  ;;  %3617 = vtanh.f32 %v475_v63 }
 0x139   :  { %v875_v3 = vpop.f32.mrb[12].mxu1 }
 0x13a   :  { %v4411_v4 = vadd.f32 %v4383_v35, %v875_v3  ;;  %v2951_v5 = vpop.f32.mrb[13].mxu1  ;;  %v1097_v3 = vld [vmem:[%s5530_s7 + $0x18] sm:$0xff] }
 0x13c   :  { %v3409_v7 = vpack.c.bf16 %v4411_v4, %v4408_v2  ;;  %v1107_v4 = vld [vmem:[%s5530_s7 + $0x68] sm:$0xff] }
 0x13d   :  { %v880_v9 = vpop.f32.mrb[14].mxu1 }
 0x13e   :  { %v2954_v10 = vpop.f32.mrb[15].mxu1  ;;  %v4416_v13 = vadd.f32 %v4383_v35, %v880_v9 }
 0x141   :  { %v885_v15 = vpop.f32.mrb[16].mxu1 }
 0x142   :  { %v3618_v16 = vpop.eup %3617  ;;  %v4419_v17 = vadd.f32 %v4383_v35, %v885_v15  ;;  %v2957_v18 = vpop.f32.mrb[17].mxu1 }
 0x143   :  { %v477_v20 = vmul.f32 %v3618_v16, %v3616_v14  ;;  %v1099_v18 = vld [vmem:[%s5530_s7 + $0x28] sm:$0xff] }
 0x144   :  { %v3413_v23 = vpack.c.bf16 %v4419_v17, %v4416_v13  ;;  %v1109_v17 = vld [vmem:[%s5530_s7 + $0x78] sm:$0xff] }
 0x145   :  { %v890_v24 = vpop.f32.mrb[18].mxu1  ;;  %478 = vst [vmem:[%s5539_s16] sm:$0xff] %v477_v20  ;;  %2916 = vmatmul.mubr.f32.vlgmr.msra.gmra.mrb[2].mxu0 %v477_v20 }
 0x146   :  { %v2960_v25 = vpop.f32.mrb[19].mxu1  ;;  %3389 = vmatpush3.bf16.msra.mxu0 %v3388_v19  ;;  %3097 = vmatprep.mubr.msk.f32.mxu0 %vm3658_vm1, %v3656_v0  ;;  %v4430_v29 = vadd.f32 %v4383_v35, %v890_v24  ;;  %v1100_v24 = vld [vmem:[%s5530_s7 + $0x30] sm:$0xff] }
 0x147   :  { %3390 = vmatprep.subr.bf16.mxu0 %v3657_v47 }
 0x149   :  { %v895_v30 = vpop.f32.mrb[20].mxu1 }
 0x14a   :  { %v4433_v31 = vadd.f32 %v4383_v35, %v895_v30  ;;  %v2963_v32 = vpop.f32.mrb[21].mxu1  ;;  %3392 = vmatpush3.bf16.msra.mxu0 %v3391_v26 }
 0x14b   :  { %3393 = vmatprep.subr.bf16.mxu0 %v3657_v47 }
 0x14c   :  { %v3417_v37 = vpack.c.bf16 %v4433_v31, %v4430_v29  ;;  %v1111_v31 = vld [vmem:[%s5530_s7 + $0x88] sm:$0xff] }
 0x14d   :  { %v900_v38 = vpop.f32.mrb[22].mxu1 }
 0x14e   :  { %v2966_v39 = vpop.f32.mrb[23].mxu1  ;;  %3395 = vmatpush3.bf16.msra.mxu0 %v3394_v33  ;;  %v4440_v42 = vadd.f32 %v4383_v35, %v900_v38 }
 0x14f   :  { %3396 = vmatprep.subr.bf16.mxu0 %v3657_v47 }
 0x151   :  { %v905_v44 = vpop.f32.mrb[24].mxu1 }
 0x152   :  { %v4443_v46 = vadd.f32 %v4383_v35, %v905_v44  ;;  %v2969_v48 = vpop.f32.mrb[25].mxu1  ;;  %3398 = vmatpush3.bf16.msra.mxu0 %v3397_v40 }
 0x153   :  { %3431 = vmatprep.subr.bf16.mxu0 %v3657_v47 }
 0x154   :  { %v3421_v51 = vpack.c.bf16 %v4443_v46, %v4440_v42  ;;  %v1113_v46 = vld [vmem:[%s5530_s7 + $0x98] sm:$0xff] }
 0x155   :  { %v910_v52 = vpop.f32.mrb[26].mxu1  ;;  %3098 = vmatmul.mubr.msk.f32.vlgmr.msra.gmra.mrb[4].mxu0 %vm636_vm2, %v1094_v49  ;;  %v1104_v49 = vld [vmem:[%s5530_s7 + $0x50] sm:$0xff] }
 0x156   :  { %v2972_v53 = vpop.f32.mrb[27].mxu1  ;;  %3100 = vmatprep.mubr.msk.f32.mxu0 %vm3658_vm1, %v3656_v0  ;;  %v4458_v56 = vadd.f32 %v4383_v35, %v910_v52 }
 0x159   :  { %v915_v57 = vpop.f32.mrb[28].mxu1  ;;  %3101 = vmatmul.mubr.msk.f32.gmra.mrb[6].mxu0 %vm636_vm2, %v1095_v54 }
 0x15a   :  { %v4462_v58 = vadd.f32 %v4383_v35, %v915_v57  ;;  %v2975_v59 = vpop.f32.mrb[29].mxu1  ;;  %3103 = vmatprep.mubr.msk.f32.mxu0 %vm3658_vm1, %v3656_v0 }
 0x15c   :  { %v3425_v62 = vpack.c.bf16 %v4462_v58, %v4458_v56  ;;  %v1115_v58 = vld [vmem:[%s5530_s7 + $0xa8] sm:$0xff] }
 0x15d   :  { %v920_v63 = vpop.f32.mrb[30].mxu1  ;;  %3104 = vmatmul.mubr.msk.f32.gmra.mrb[8].mxu0 %vm636_vm2, %v1096_v60  ;;  %v1106_v60 = vld [vmem:[%s5530_s7 + $0x60] sm:$0xff] }
 0x15e   :  { %v2978_v1 = vpop.f32.mrb[31].mxu1  ;;  %3106 = vmatprep.mubr.msk.f32.mxu0 %vm3658_vm1, %v3656_v0  ;;  %v4478_v5 = vadd.f32 %v4383_v35, %v920_v63 }
 0x161   :  { %v925_v9 = vpop.f32.mrb[32].mxu1  ;;  %3107 = vmatmul.mubr.msk.f32.gmra.mrb[10].mxu0 %vm636_vm2, %v1097_v3 }
 0x162   :  { %v4482_v10 = vadd.f32 %v4383_v35, %v925_v9  ;;  %v2981_v11 = vpop.f32.mrb[33].mxu1  ;;  %3109 = vmatprep.mubr.msk.f32.mxu0 %vm3658_vm1, %v3656_v0 }
 0x164   :  { %v3429_v14 = vpack.c.bf16 %v4482_v10, %v4478_v5  ;;  %v1117_v10 = vld [vmem:[%s5530_s7 + $0xb8] sm:$0xff] }
 0x165   :  { %v930_v15 = vpop.f32.mrb[34].mxu1  ;;  %3110 = vmatmul.mubr.msk.f32.gmra.mrb[12].mxu0 %vm636_vm2, %v1098_v12  ;;  %v1108_v12 = vld [vmem:[%s5530_s7 + $0x70] sm:$0xff] }
 0x166   :  { %v2984_v16 = vpop.f32.mrb[35].mxu1  ;;  %3112 = vmatprep.mubr.msk.f32.mxu0 %vm3658_vm1, %v3656_v0  ;;  %v931_v19 = vadd.f32 %v4383_v35, %v930_v15 }
 0x169   :  { %v935_v20 = vpop.f32.mrb[36].mxu1  ;;  %3113 = vmatmul.mubr.msk.f32.gmra.mrb[14].mxu0 %vm636_vm2, %v1099_v18 }
 0x16a   :  { %v936_v21 = vadd.f32 %v4383_v35, %v935_v20  ;;  %v2987_v22 = vpop.f32.mrb[37].mxu1  ;;  %3115 = vmatprep.mubr.msk.f32.mxu0 %vm3658_vm1, %v3656_v0 }
 0x16c   :  { %v3399_v25 = vpack.c.bf16 %v936_v21, %v931_v19  ;;  %v1110_v21 = vld [vmem:[%s5530_s7 + $0x80] sm:$0xff] }
 0x16d   :  { %v940_v26 = vpop.f32.mrb[38].mxu1  ;;  %3116 = vmatmul.mubr.msk.f32.gmra.mrb[16].mxu0 %vm636_vm2, %v1100_v24 }
 0x16e   :  { %v2990_v27 = vpop.f32.mrb[39].mxu1  ;;  %3400 = vmatprep.subr.bf16.mxu1 %v3399_v25  ;;  %3118 = vmatprep.mubr.msk.f32.mxu0 %vm3658_vm1, %v3656_v0  ;;  %v941_v30 = vadd.f32 %v4383_v35, %v940_v26 }
 0x16f   :  { %3402 = vmatpush3.bf16.xpose.msra.mxu1 %v3401_v45 }
 0x171   :  { %v945_v32 = vpop.f32.mrb[40].mxu1  ;;  %3119 = vmatmul.mubr.msk.f32.gmra.mrb[18].mxu0 %vm636_vm2, %v1101_v28  ;;  %v1112_v28 = vld [vmem:[%s5530_s7 + $0x90] sm:$0xff] }
 0x172   :  { %v946_v33 = vadd.f32 %v4383_v35, %v945_v32  ;;  %v2993_v34 = vpop.f32.mrb[41].mxu1  ;;  %3121 = vmatprep.mubr.msk.f32.mxu0 %vm3658_vm1, %v3656_v0 }
 0x174   :  { %v3403_v38 = vpack.c.bf16 %v946_v33, %v941_v30 }
 0x175   :  { %v950_v39 = vpop.f32.mrb[42].mxu1  ;;  %3122 = vmatmul.mubr.msk.f32.gmra.mrb[20].mxu0 %vm636_vm2, %v1102_v36 }
 0x176   :  { %v2996_v41 = vpop.f32.mrb[43].mxu1  ;;  %3404 = vmatprep.subr.bf16.mxu1 %v3403_v38  ;;  %3124 = vmatprep.mubr.msk.f32.mxu0 %vm3658_vm1, %v3656_v0  ;;  %v951_v45 = vadd.f32 %v4383_v35, %v950_v39  ;;  %v1114_v38 = vld [vmem:[%s5530_s7 + $0xa0] sm:$0xff] }
 0x177   :  { %3406 = vmatpush3.bf16.xpose.msra.mxu1 %v3405_v61 }
 0x179   :  { %v955_v40 = vpop.f32.mrb[44].mxu1  ;;  %3125 = vmatmul.mubr.msk.f32.gmra.mrb[22].mxu0 %vm636_vm2, %v1103_v43 }
 0x17a   :  { %v956_v44 = vadd.f32 %v4383_v35, %v955_v40  ;;  %v2999_v48 = vpop.f32.mrb[45].mxu1  ;;  %3127 = vmatprep.mubr.msk.f32.mxu0 %vm3658_vm1, %v3656_v0 }
 0x17c   :  { %v3407_v52 = vpack.c.bf16 %v956_v44, %v951_v45  ;;  %v1116_v44 = vld [vmem:[%s5530_s7 + $0xb0] sm:$0xff] }
 0x17d   :  { %v960_v53 = vpop.f32.mrb[46].mxu1  ;;  %3128 = vmatmul.mubr.msk.f32.gmra.mrb[24].mxu0 %vm636_vm2, %v1104_v49 }
 0x17e   :  { %v3002_v50 = vpop.f32.mrb[47].mxu1  ;;  %3408 = vmatprep.subr.bf16.mxu1 %v3407_v52  ;;  %3130 = vmatprep.mubr.msk.f32.mxu0 %vm3658_vm1, %v3656_v0  ;;  %v961_v61 = vadd.f32 %v4383_v35, %v960_v53 }
 0x17f   :  { %3410 = vmatpush3.bf16.xpose.msra.mxu1 %v3409_v7  ;;  %v1118_v50 = vld [vmem:[%s5530_s7 + $0xc0] sm:$0xff] }
 0x181   :  { %v965_v54 = vpop.f32.mrb[48].mxu1  ;;  %3131 = vmatmul.mubr.msk.f32.gmra.mrb[26].mxu0 %vm636_vm2, %v1105_v55 }
 0x182   :  { %v966_v57 = vadd.f32 %v4383_v35, %v965_v54  ;;  %v3005_v59 = vpop.f32.mrb[49].mxu1  ;;  %3133 = vmatprep.mubr.msk.f32.mxu0 %vm3658_vm1, %v3656_v0 }
 0x184   :  { %v3411_v63 = vpack.c.bf16 %v966_v57, %v961_v61  ;;  %v1119_v57 = vld [vmem:[%s5530_s7 + $0xc8] sm:$0xff] }
 0x185   :  { %v970_v1 = vpop.f32.mrb[50].mxu1  ;;  %3134 = vmatmul.mubr.msk.f32.gmra.mrb[28].mxu0 %vm636_vm2, %v1106_v60 }
 0x186   :  { %v3008_v2 = vpop.f32.mrb[51].mxu1  ;;  %3412 = vmatprep.subr.bf16.mxu1 %v3411_v63  ;;  %3136 = vmatprep.mubr.msk.f32.mxu0 %vm3658_vm1, %v3656_v0  ;;  %v971_v7 = vadd.f32 %v4383_v35, %v970_v1  ;;  %v1120_v1 = vld [vmem:[%s5530_s7 + $0xd0] sm:$0xff] }
 0x187   :  { %3414 = vmatpush3.bf16.xpose.msra.mxu1 %v3413_v23 }
 0x189   :  { %v975_v3 = vpop.f32.mrb[52].mxu1  ;;  %3137 = vmatmul.mubr.msk.f32.gmra.mrb[30].mxu0 %vm636_vm2, %v1107_v4 }
 0x18a   :  { %v976_v9 = vadd.f32 %v4383_v35, %v975_v3  ;;  %v3011_v11 = vpop.f32.mrb[53].mxu1  ;;  %3139 = vmatprep.mubr.msk.f32.mxu0 %vm3658_vm1, %v3656_v0 }
 0x18c   :  { %v3415_v15 = vpack.c.bf16 %v976_v9, %v971_v7  ;;  %v1121_v9 = vld [vmem:[%s5530_s7 + $0xd8] sm:$0xff] }
 0x18d   :  { %v980_v16 = vpop.f32.mrb[54].mxu1  ;;  %3140 = vmatmul.mubr.msk.f32.gmra.mrb[32].mxu0 %vm636_vm2, %v1108_v12 }
 0x18e   :  { %v3014_v13 = vpop.f32.mrb[55].mxu1  ;;  %3416 = vmatprep.subr.bf16.mxu1 %v3415_v15  ;;  %3142 = vmatprep.mubr.msk.f32.mxu0 %vm3658_vm1, %v3656_v0  ;;  %v981_v23 = vadd.f32 %v4383_v35, %v980_v16  ;;  %v1122_v16 = vld [vmem:[%s5530_s7 + $0xe0] sm:$0xff] }
 0x18f   :  { %3418 = vmatpush3.bf16.xpose.msra.mxu1 %v3417_v37 }
 0x191   :  { %v985_v18 = vpop.f32.mrb[56].mxu1  ;;  %3143 = vmatmul.mubr.msk.f32.gmra.mrb[34].mxu0 %vm636_vm2, %v1109_v17 }
 0x192   :  { %v986_v19 = vadd.f32 %v4383_v35, %v985_v18  ;;  %v3017_v20 = vpop.f32.mrb[57].mxu1  ;;  %3145 = vmatprep.mubr.msk.f32.mxu0 %vm3658_vm1, %v3656_v0 }
 0x194   :  { %v3419_v22 = vpack.c.bf16 %v986_v19, %v981_v23  ;;  %v1123_v19 = vld [vmem:[%s5530_s7 + $0xe8] sm:$0xff] }
 0x195   :  { %v990_v24 = vpop.f32.mrb[58].mxu1  ;;  %3146 = vmatmul.mubr.msk.f32.gmra.mrb[36].mxu0 %vm636_vm2, %v1110_v21 }
 0x196   :  { %v3020_v29 = vpop.f32.mrb[59].mxu1  ;;  %3420 = vmatprep.subr.bf16.mxu1 %v3419_v22  ;;  %3148 = vmatprep.mubr.msk.f32.mxu0 %vm3658_vm1, %v3656_v0  ;;  %v991_v37 = vadd.f32 %v4383_v35, %v990_v24  ;;  %v1124_v24 = vld [vmem:[%s5530_s7 + $0xf0] sm:$0xff] }
 0x197   :  { %3422 = vmatpush3.bf16.xpose.msra.mxu1 %v3421_v51 }
 0x199   :  { %v995_v25 = vpop.f32.mrb[60].mxu1  ;;  %3149 = vmatmul.mubr.msk.f32.gmra.mrb[38].mxu0 %vm636_vm2, %v1111_v31 }
 0x19a   :  { %v996_v26 = vadd.f32 %v4383_v35, %v995_v25  ;;  %v3023_v27 = vpop.f32.mrb[61].mxu1  ;;  %3151 = vmatprep.mubr.msk.f32.mxu0 %vm3658_vm1, %v3656_v0 }
 0x19c   :  { %v3423_v30 = vpack.c.bf16 %v996_v26, %v991_v37  ;;  %v1125_v26 = vld [vmem:[%s5530_s7 + $0xf8] sm:$0xff] }
 0x19d   :  { %v1000_v32 = vpop.f32.mrb[62].mxu1  ;;  %3152 = vmatmul.mubr.msk.f32.gmra.mrb[40].mxu0 %vm636_vm2, %v1112_v28 }
 0x19e   :  { %v3026_v42 = vpop.f32.mrb[63].mxu1  ;;  %3424 = vmatprep.subr.bf16.mxu1 %v3423_v30  ;;  %3154 = vmatprep.mubr.msk.f32.mxu0 %vm3658_vm1, %v3656_v0  ;;  %v1001_v51 = vadd.f32 %v4383_v35, %v1000_v32  ;;  %v1126_v32 = vld [vmem:[%s5530_s7 + $0x100] sm:$0xff] }
 0x19f   :  { %3426 = vmatpush3.bf16.xpose.msra.mxu1 %v3425_v62 }
 0x1a1   :  { %v1005_v33 = vpop.f32.mrb[64].mxu1  ;;  %3155 = vmatmul.mubr.msk.f32.gmra.mrb[42].mxu0 %vm636_vm2, %v1113_v46 }
 0x1a2   :  { %v1006_v34 = vadd.f32 %v4383_v35, %v1005_v33  ;;  %v3029_v36 = vpop.f32.mrb[65].mxu1  ;;  %3157 = vmatprep.mubr.msk.f32.mxu0 %vm3658_vm1, %v3656_v0 }
 0x1a4   :  { %v3427_v39 = vpack.c.bf16 %v1006_v34, %v1001_v51  ;;  %v1127_v34 = vld [vmem:[%s5530_s7 + $0x108] sm:$0xff] }
 0x1a5   :  { %v1010_v41 = vpop.f32.mrb[66].mxu1  ;;  %3158 = vmatmul.mubr.msk.f32.gmra.mrb[44].mxu0 %vm636_vm2, %v1114_v38 }
 0x1a6   :  { %v3032_v56 = vpop.f32.mrb[67].mxu1  ;;  %3428 = vmatprep.subr.bf16.mxu1 %v3427_v39  ;;  %3160 = vmatprep.mubr.msk.f32.mxu0 %vm3658_vm1, %v3656_v0  ;;  %v1011_v62 = vadd.f32 %v4383_v35, %v1010_v41  ;;  %v1128_v41 = vld [vmem:[%s5530_s7 + $0x110] sm:$0xff] }
 0x1a7   :  { %3430 = vmatpush3.bf16.xpose.msra.mxu1 %v3429_v14 }
 0x1a9   :  { %v1015_v43 = vpop.f32.mrb[68].mxu1  ;;  %3161 = vmatmul.mubr.msk.f32.gmra.mrb[46].mxu0 %vm636_vm2, %v1115_v58 }
 0x1aa   :  { %v1016_v45 = vadd.f32 %v4383_v35, %v1015_v43  ;;  %v3035_v40 = vpop.f32.mrb[69].mxu1  ;;  %3163 = vmatprep.mubr.msk.f32.mxu0 %vm3658_vm1, %v3656_v0 }
 0x1ac   :  { %v3432_v48 = vpack.c.bf16 %v1016_v45, %v1011_v62  ;;  %v1129_v45 = vld [vmem:[%s5530_s7 + $0x118] sm:$0xff] }
 0x1ad   :  { %3164 = vmatmul.mubr.msk.f32.gmra.mrb[48].mxu0 %vm636_vm2, %v1116_v44  ;;  %v1020_v5 = vpop.f32.mrb[70].mxu1 }
 0x1ae   :  { %3433 = vmatpush1.bf16.xpose.msra.mxu0 %v3432_v48  ;;  %3166 = vmatprep.mubr.msk.f32.mxu0 %vm3658_vm1, %v3656_v0  ;;  %v3038_v14 = vpop.f32.mrb[71].mxu1  ;;  %v1021_v49 = vadd.f32 %v4383_v35, %v1020_v5  ;;  %v1130_v5 = vld [vmem:[%s5530_s7 + $0x120] sm:$0xff] }
 0x1af   :  { %3434 = vmatprep.subr.bf16.mxu0 %v3657_v47 }
 0x1b1   :  { %3167 = vmatmul.mubr.msk.f32.gmra.mrb[50].mxu0 %vm636_vm2, %v1117_v10  ;;  %v1025_v52 = vpop.f32.mrb[72].mxu1 }
 0x1b2   :  { %3169 = vmatprep.mubr.msk.f32.mxu0 %vm3658_vm1, %v3656_v0  ;;  %v1026_v53 = vadd.f32 %v4383_v35, %v1025_v52  ;;  %v3041_v55 = vpop.f32.mrb[73].mxu1 }
 0x1b3   :  { %v1132_v55 = vld [vmem:[%s5530_s7 + $0x130] sm:$0xff] }
 0x1b4   :  { %v3435_v61 = vpack.c.bf16 %v1026_v53, %v1021_v49  ;;  %v1131_v53 = vld [vmem:[%s5530_s7 + $0x128] sm:$0xff] }
 0x1b5   :  { %3170 = vmatmul.mubr.msk.f32.gmra.mrb[52].mxu0 %vm636_vm2, %v1118_v50  ;;  %v1030_v54 = vpop.f32.mrb[74].mxu1 }
 0x1b6   :  { %3172 = vmatprep.mubr.msk.f32.mxu0 %vm3658_vm1, %v3656_v0  ;;  %3436 = vmatpush1.bf16.xpose.msra.mxu0 %v3435_v61  ;;  %v3044_v59 = vpop.f32.mrb[75].mxu1  ;;  %v1031_v60 = vadd.f32 %v4383_v35, %v1030_v54  ;;  %v1133_v54 = vld [vmem:[%s5530_s7 + $0x138] sm:$0xff] }
 0x1b7   :  { %3437 = vmatprep.subr.bf16.mxu0 %v3657_v47  ;;  %v1136_v59 = vld [vmem:[%s5530_s7 + $0x150] sm:$0xff] }
 0x1b9   :  { %3173 = vmatmul.mubr.msk.f32.gmra.mrb[54].mxu0 %vm636_vm2, %v1119_v57  ;;  %v1035_v63 = vpop.f32.mrb[76].mxu1  ;;  %v1135_v57 = vld [vmem:[%s5530_s7 + $0x148] sm:$0xff] }
 0x1ba   :  { %3175 = vmatprep.mubr.msk.f32.mxu0 %vm3658_vm1, %v3656_v0  ;;  %v1036_v2 = vadd.f32 %v4383_v35, %v1035_v63  ;;  %v3047_v4 = vpop.f32.mrb[77].mxu1  ;;  %v1138_v63 = vld [vmem:[%s5530_s7 + $0x160] sm:$0xff] }
 0x1bb   :  { %v1141_v4 = vld [vmem:[%s5530_s7 + $0x178] sm:$0xff] }
 0x1bc   :  { %v3438_v7 = vpack.c.bf16 %v1036_v2, %v1031_v60  ;;  %v1137_v60 = vld [vmem:[%s5530_s7 + $0x158] sm:$0xff]  ;;  %v1140_v2 = vld [vmem:[%s5530_s7 + $0x170] sm:$0xff] }
 0x1bd   :  { %3176 = vmatmul.mubr.msk.f32.gmra.mrb[56].mxu0 %vm636_vm2, %v1120_v1  ;;  %v1040_v3 = vpop.f32.mrb[78].mxu1  ;;  %v1139_v1 = vld [vmem:[%s5530_s7 + $0x168] sm:$0xff] }
 0x1be   :  { %3178 = vmatprep.mubr.msk.f32.mxu0 %vm3658_vm1, %v3656_v0  ;;  %3439 = vmatpush1.bf16.xpose.msra.mxu0 %v3438_v7  ;;  %v3050_v11 = vpop.f32.mrb[79].mxu1  ;;  %v1041_v12 = vadd.f32 %v4383_v35, %v1040_v3  ;;  %v1142_v7 = vld [vmem:[%s5530_s7 + $0x180] sm:$0xff] }
 0x1bf   :  { %3440 = vmatprep.subr.bf16.mxu0 %v3657_v47  ;;  %v2478_v3 = vld [vmem:[%s5536_s13] ss:$0 sm:$0xff] }
 0x1c1   :  { %3179 = vmatmul.mubr.msk.f32.gmra.mrb[58].mxu0 %vm636_vm2, %v1121_v9  ;;  %v1045_v15 = vpop.f32.mrb[80].mxu1 }
 0x1c2   :  { %3181 = vmatprep.mubr.msk.f32.mxu0 %vm3658_vm1, %v3656_v0  ;;  %v1046_v13 = vadd.f32 %v4383_v35, %v1045_v15  ;;  %v3053_v17 = vpop.f32.mrb[81].mxu1 }
 0x1c4   :  { %v3441_v23 = vpack.c.bf16 %v1046_v13, %v1041_v12 }
 0x1c5   :  { %3182 = vmatmul.mubr.msk.f32.gmra.mrb[60].mxu0 %vm636_vm2, %v1122_v16  ;;  %v1050_v18 = vpop.f32.mrb[82].mxu1  ;;  %v4829_v16 = vld [vmem:[%s5536_s13 + $0x2] ss:$0 sm:$0xff] }
 0x1c6   :  { %3184 = vmatprep.mubr.msk.f32.mxu0 %vm3658_vm1, %v3656_v0  ;;  %3442 = vmatpush1.bf16.xpose.msra.mxu0 %v3441_v23  ;;  %v3056_v20 = vpop.f32.mrb[83].mxu1  ;;  %v1051_v21 = vadd.f32 %v4383_v35, %v1050_v18 }
 0x1c7   :  { %3443 = vmatprep.subr.bf16.mxu0 %v3657_v47 }
 0x1c9   :  { %3185 = vmatmul.mubr.msk.f32.gmra.mrb[62].mxu0 %vm636_vm2, %v1123_v19  ;;  %v1055_v22 = vpop.f32.mrb[84].mxu1 }
 0x1ca   :  { %3187 = vmatprep.mubr.msk.f32.mxu0 %vm3658_vm1, %v3656_v0  ;;  %v1056_v29 = vadd.f32 %v4383_v35, %v1055_v22  ;;  %v3059_v31 = vpop.f32.mrb[85].mxu1 }
 0x1cc   :  { %v3444_v37 = vpack.c.bf16 %v1056_v29, %v1051_v21 }
 0x1cd   :  { %3188 = vmatmul.mubr.msk.f32.gmra.mrb[64].mxu0 %vm636_vm2, %v1124_v24  ;;  %v1060_v25 = vpop.f32.mrb[86].mxu1 }
 0x1ce   :  { %3190 = vmatprep.mubr.msk.f32.mxu0 %vm3658_vm1, %v3656_v0  ;;  %3445 = vmatpush1.bf16.xpose.msra.mxu0 %v3444_v37  ;;  %v3062_v27 = vpop.f32.mrb[87].mxu1  ;;  %v1061_v28 = vadd.f32 %v4383_v35, %v1060_v25 }
 0x1cf   :  { %3446 = vmatprep.subr.bf16.mxu0 %v3657_v47 }
 0x1d1   :  { %3191 = vmatmul.mubr.msk.f32.gmra.mrb[66].mxu0 %vm636_vm2, %v1125_v26  ;;  %v1065_v30 = vpop.f32.mrb[88].mxu1 }
 0x1d2   :  { %3193 = vmatprep.mubr.msk.f32.mxu0 %vm3658_vm1, %v3656_v0  ;;  %v1066_v42 = vadd.f32 %v4383_v35, %v1065_v30  ;;  %v3065_v46 = vpop.f32.mrb[89].mxu1 }
 0x1d4   :  { %v3447_v51 = vpack.c.bf16 %v1066_v42, %v1061_v28 }
 0x1d5   :  { %3194 = vmatmul.mubr.msk.f32.gmra.mrb[68].mxu0 %vm636_vm2, %v1126_v32  ;;  %v1070_v33 = vpop.f32.mrb[90].mxu1 }
 0x1d6   :  { %3196 = vmatprep.mubr.msk.f32.mxu0 %vm3658_vm1, %v3656_v0  ;;  %3448 = vmatpush1.bf16.xpose.msra.mxu0 %v3447_v51  ;;  %v3068_v36 = vpop.f32.mrb[91].mxu1  ;;  %v1071_v38 = vadd.f32 %v4383_v35, %v1070_v33 }
 0x1d7   :  { %3449 = vmatprep.subr.bf16.mxu0 %v3657_v47 }
 0x1d9   :  { %3197 = vmatmul.mubr.msk.f32.gmra.mrb[70].mxu0 %vm636_vm2, %v1127_v34  ;;  %v1075_v39 = vpop.f32.mrb[92].mxu1 }
 0x1da   :  { %3199 = vmatprep.mubr.msk.f32.mxu0 %vm3658_vm1, %v3656_v0  ;;  %v1076_v56 = vadd.f32 %v4383_v35, %v1075_v39  ;;  %v3071_v58 = vpop.f32.mrb[93].mxu1 }
 0x1dc   :  { %v3450_v62 = vpack.c.bf16 %v1076_v56, %v1071_v38 }
 0x1dd   :  { %3200 = vmatmul.mubr.msk.f32.gmra.mrb[72].mxu0 %vm636_vm2, %v1128_v41  ;;  %v1080_v43 = vpop.f32.mrb[94].mxu1 }
 0x1de   :  { %3202 = vmatprep.mubr.msk.f32.mxu0 %vm3658_vm1, %v3656_v0  ;;  %3451 = vmatpush1.bf16.xpose.msra.mxu0 %v3450_v62  ;;  %v3074_v40 = vpop.f32.mrb[95].mxu1  ;;  %v1081_v44 = vadd.f32 %v4383_v35, %v1080_v43 }
 0x1df   :  { %3452 = vmatprep.subr.bf16.mxu0 %v3657_v47 }
 0x1e1   :  { %3203 = vmatmul.mubr.msk.f32.gmra.mrb[74].mxu0 %vm636_vm2, %v1129_v45  ;;  %v1085_v48 = vpop.f32.mrb[96].mxu1 }
 0x1e2   :  { %3205 = vmatprep.mubr.msk.f32.mxu0 %vm3658_vm1, %v3656_v0  ;;  %v1086_v10 = vadd.f32 %v4383_v35, %v1085_v48  ;;  %v3077_v14 = vpop.f32.mrb[97].mxu1 }
 0x1e4   :  { %v3453_v49 = vpack.c.bf16 %v1086_v10, %v1081_v44 }
 0x1e5   :  { %3206 = vmatmul.mubr.msk.f32.gmra.mrb[76].mxu0 %vm636_vm2, %v1130_v5  ;;  %v1090_v52 = vpop.f32.mrb[98].mxu1 }
 0x1e6   :  { %3208 = vmatprep.mubr.msk.f32.mxu0 %vm3658_vm1, %v3656_v0  ;;  %3454 = vmatpush1.bf16.xpose.msra.mxu0 %v3453_v49  ;;  %v3080_v50 = vpop.f32.mrb[99].mxu1  ;;  %v1091_v61 = vadd.f32 %v4383_v35, %v1090_v52  ;;  %v1134_v35 = vld [vmem:[%s5530_s7 + $0x140] sm:$0xff] }
 0x1e7   :  { %1719 = vmatprep.subr.mxu0 %v3656_v0 }
 0x1e9   :  { %3209 = vmatmul.mubr.msk.f32.gmra.mrb[78].mxu0 %vm636_vm2, %v1131_v53 }
 0x1ea   :  { %3211 = vmatprep.mubr.msk.f32.mxu0 %vm3658_vm1, %v3656_v0 }
 0x1ed   :  { %3212 = vmatmul.mubr.msk.f32.gmra.mrb[80].mxu0 %vm636_vm2, %v1132_v55 }
 0x1ee   :  { %3214 = vmatprep.mubr.msk.f32.mxu0 %vm3658_vm1, %v3656_v0  ;;  %1720 = vmatpush1.xpose.msra.mxu0 %v1091_v61 }
 0x1ef   :  { %3487 = vmatprep.subr.bf16.mxu0 %v3657_v47 }
 0x1f1   :  { %3215 = vmatmul.mubr.msk.f32.gmra.mrb[82].mxu0 %vm636_vm2, %v1133_v54 }
 0x1f2   :  { %3217 = vmatprep.mubr.msk.f32.mxu0 %vm3658_vm1, %v3656_v0 }
 0x1f5   :  { %3218 = vmatmul.mubr.msk.f32.gmra.mrb[84].mxu0 %vm636_vm2, %v1134_v35 }
 0x1f6   :  { %3220 = vmatprep.mubr.msk.f32.mxu0 %vm3658_vm1, %v3656_v0 }
 0x1f9   :  { %3221 = vmatmul.mubr.msk.f32.gmra.mrb[86].mxu0 %vm636_vm2, %v1135_v57 }
 0x1fa   :  { %3223 = vmatprep.mubr.msk.f32.mxu0 %vm3658_vm1, %v3656_v0 }
 0x1fd   :  { %3224 = vmatmul.mubr.msk.f32.gmra.mrb[88].mxu0 %vm636_vm2, %v1136_v59 }
 0x1fe   :  { %3226 = vmatprep.mubr.msk.f32.mxu0 %vm3658_vm1, %v3656_v0 }
 0x201   :  { %3227 = vmatmul.mubr.msk.f32.gmra.mrb[90].mxu0 %vm636_vm2, %v1137_v60 }
 0x202   :  { %3229 = vmatprep.mubr.msk.f32.mxu0 %vm3658_vm1, %v3656_v0 }
 0x205   :  { %3230 = vmatmul.mubr.msk.f32.gmra.mrb[92].mxu0 %vm636_vm2, %v1138_v63 }
 0x206   :  { %3232 = vmatprep.mubr.msk.f32.mxu0 %vm3658_vm1, %v3656_v0 }
 0x209   :  { %3233 = vmatmul.mubr.msk.f32.gmra.mrb[94].mxu0 %vm636_vm2, %v1139_v1 }
 0x20a   :  { %3235 = vmatprep.mubr.msk.f32.mxu0 %vm3658_vm1, %v3656_v0 }
 0x20d   :  { %3236 = vmatmul.mubr.msk.f32.gmra.mrb[96].mxu0 %vm636_vm2, %v1140_v2 }
 0x20e   :  { %3238 = vmatprep.mubr.msk.f32.mxu0 %vm3658_vm1, %v3656_v0 }
 0x211   :  { %3239 = vmatmul.mubr.msk.f32.gmra.mrb[98].mxu0 %vm636_vm2, %v1141_v4 }
 0x212   :  { %3241 = vmatprep.mubr.msk.f32.mxu0 %vm3658_vm1, %v3656_v0 }
 0x215   :  { %3242 = vmatmul.mubr.msk.f32.gmra.mrb[100].mxu0 %vm636_vm2, %v1142_v7 }
 0x216   :  { %1751 = vmatprep.mubr.f32.mxu0 %v3656_v0 }
 0x218   :  { %v570_v9 = vpop.f32.mrb[2].mxu0 }
 0x219   :  { %v571_v11 = vadd.f32 %v2478_v3, %v570_v9  ;;  %v2917_v12 = vpop.f32.mrb[3].mxu0 }
 0x21b   :  { %v574_v15 = vmul.f32 0.17677669, %v571_v11 }
 0x21d   :  { %2794 = vmatprep.mubr.f32.mxu1 %v574_v15  ;;  %1752 = vmatmul.mubr.f32.vlgmr.msra.gmra.mrb[102].mxu0 %v574_v15 }
 0x21e   :  { %2795 = vmatmul.mubr.f32.vlgmr.msra.gmra.mrb[100].mxu1 %v574_v15 }
 0x228   :  { %v1368_v13 = vpop.f32.mrb[4].mxu0 }
 0x229   :  { %v3099_v17 = vpop.f32.mrb[5].mxu0  ;;  %v4832_v23 = vadd.f32 %v4829_v16, %v1368_v13 }
 0x22c   :  { %v1373_v18 = vpop.f32.mrb[6].mxu0 }
 0x22d   :  { %v1374_v19 = vadd.f32 %v4829_v16, %v1373_v18  ;;  %v3102_v20 = vpop.f32.mrb[7].mxu0 }
 0x22f   :  { %v3457_v21 = vpack.c.bf16 %v1374_v19, %v4832_v23 }
 0x230   :  { %v1378_v22 = vpop.f32.mrb[8].mxu0 }
 0x231   :  { %v3105_v24 = vpop.f32.mrb[9].mxu0  ;;  %v4837_v29 = vadd.f32 %v4829_v16, %v1378_v22 }
 0x234   :  { %v1383_v31 = vpop.f32.mrb[10].mxu0 }
 0x235   :  { %v4840_v37 = vadd.f32 %v4829_v16, %v1383_v31  ;;  %v3108_v25 = vpop.f32.mrb[11].mxu0 }
 0x237   :  { %v3461_v26 = vpack.c.bf16 %v4840_v37, %v4837_v29 }
 0x238   :  { %v1388_v27 = vpop.f32.mrb[12].mxu0 }
 0x239   :  { %v3111_v28 = vpop.f32.mrb[13].mxu0  ;;  %v4845_v30 = vadd.f32 %v4829_v16, %v1388_v27 }
 0x23c   :  { %v1393_v32 = vpop.f32.mrb[14].mxu0 }
 0x23d   :  { %v4848_v42 = vadd.f32 %v4829_v16, %v1393_v32  ;;  %v3114_v46 = vpop.f32.mrb[15].mxu0 }
 0x23f   :  { %v3465_v51 = vpack.c.bf16 %v4848_v42, %v4845_v30 }
 0x240   :  { %v1398_v33 = vpop.f32.mrb[16].mxu0 }
 0x241   :  { %v3117_v34 = vpop.f32.mrb[17].mxu0  ;;  %v4853_v36 = vadd.f32 %v4829_v16, %v1398_v33 }
 0x244   :  { %v1403_v38 = vpop.f32.mrb[18].mxu0 }
 0x245   :  { %v4856_v39 = vadd.f32 %v4829_v16, %v1403_v38  ;;  %v3120_v41 = vpop.f32.mrb[19].mxu0 }
 0x247   :  { %v3469_v56 = vpack.c.bf16 %v4856_v39, %v4853_v36 }
 0x248   :  { %v1408_v58 = vpop.f32.mrb[20].mxu0 }
 0x249   :  { %v3123_v62 = vpop.f32.mrb[21].mxu0  ;;  %v4861_v43 = vadd.f32 %v4829_v16, %v1408_v58 }
 0x24c   :  { %v1413_v45 = vpop.f32.mrb[22].mxu0 }
 0x24d   :  { %v4864_v40 = vadd.f32 %v4829_v16, %v1413_v45  ;;  %v3126_v44 = vpop.f32.mrb[23].mxu0 }
 0x24f   :  { %v3473_v48 = vpack.c.bf16 %v4864_v40, %v4861_v43 }
 0x250   :  { %v1418_v5 = vpop.f32.mrb[24].mxu0 }
 0x251   :  { %v3129_v10 = vpop.f32.mrb[25].mxu0  ;;  %v4869_v14 = vadd.f32 %v4829_v16, %v1418_v5 }
 0x254   :  { %v1423_v49 = vpop.f32.mrb[26].mxu0 }
 0x255   :  { %v4872_v52 = vadd.f32 %v4829_v16, %v1423_v49  ;;  %v3132_v53 = vpop.f32.mrb[27].mxu0 }
 0x257   :  { %v3477_v50 = vpack.c.bf16 %v4872_v52, %v4869_v14 }
 0x258   :  { %v1428_v55 = vpop.f32.mrb[28].mxu0 }
 0x259   :  { %v3135_v61 = vpop.f32.mrb[29].mxu0  ;;  %v4877_v54 = vadd.f32 %v4829_v16, %v1428_v55 }
 0x25c   :  { %v1433_v35 = vpop.f32.mrb[30].mxu0 }
 0x25d   :  { %v4880_v57 = vadd.f32 %v4829_v16, %v1433_v35  ;;  %v3138_v59 = vpop.f32.mrb[31].mxu0 }
 0x25f   :  { %v3481_v60 = vpack.c.bf16 %v4880_v57, %v4877_v54 }
 0x260   :  { %v1438_v63 = vpop.f32.mrb[32].mxu0 }
 0x261   :  { %v3141_v1 = vpop.f32.mrb[33].mxu0  ;;  %v4885_v2 = vadd.f32 %v4829_v16, %v1438_v63 }
 0x264   :  { %v1443_v4 = vpop.f32.mrb[34].mxu0 }
 0x265   :  { %v4888_v7 = vadd.f32 %v4829_v16, %v1443_v4  ;;  %v3144_v3 = vpop.f32.mrb[35].mxu0 }
 0x267   :  { %v3485_v9 = vpack.c.bf16 %v4888_v7, %v4885_v2 }
 0x268   :  { %v1448_v11 = vpop.f32.mrb[36].mxu0 }
 0x269   :  { %v3147_v12 = vpop.f32.mrb[37].mxu0  ;;  %v1449_v15 = vadd.f32 %v4829_v16, %v1448_v11 }
 0x26c   :  { %v1453_v13 = vpop.f32.mrb[38].mxu0 }
 0x26d   :  { %v1454_v17 = vadd.f32 %v4829_v16, %v1453_v13  ;;  %v3150_v23 = vpop.f32.mrb[39].mxu0 }
 0x26f   :  { %v3455_v18 = vpack.c.bf16 %v1454_v17, %v1449_v15 }
 0x270   :  { %v1458_v19 = vpop.f32.mrb[40].mxu0 }
 0x271   :  { %3456 = vmatprep.subr.bf16.mxu1 %v3455_v18  ;;  %v3153_v20 = vpop.f32.mrb[41].mxu0  ;;  %v1459_v22 = vadd.f32 %v4829_v16, %v1458_v19 }
 0x272   :  { %3458 = vmatpush3.bf16.msra.mxu1 %v3457_v21 }
 0x274   :  { %v1463_v24 = vpop.f32.mrb[42].mxu0 }
 0x275   :  { %v1464_v29 = vadd.f32 %v4829_v16, %v1463_v24  ;;  %v3156_v31 = vpop.f32.mrb[43].mxu0 }
 0x277   :  { %v3459_v37 = vpack.c.bf16 %v1464_v29, %v1459_v22 }
 0x278   :  { %v1468_v25 = vpop.f32.mrb[44].mxu0 }
 0x279   :  { %3460 = vmatprep.subr.bf16.mxu1 %v3459_v37  ;;  %v3159_v27 = vpop.f32.mrb[45].mxu0  ;;  %v1469_v28 = vadd.f32 %v4829_v16, %v1468_v25 }
 0x27a   :  { %3462 = vmatpush3.bf16.msra.mxu1 %v3461_v26 }
 0x27c   :  { %v1473_v32 = vpop.f32.mrb[46].mxu0 }
 0x27d   :  { %v1474_v46 = vadd.f32 %v4829_v16, %v1473_v32  ;;  %v3162_v33 = vpop.f32.mrb[47].mxu0 }
 0x27f   :  { %v3463_v34 = vpack.c.bf16 %v1474_v46, %v1469_v28 }
 0x280   :  { %v1478_v38 = vpop.f32.mrb[48].mxu0 }
 0x281   :  { %3464 = vmatprep.subr.bf16.mxu1 %v3463_v34  ;;  %v3165_v21 = vpop.f32.mrb[49].mxu0  ;;  %v1479_v41 = vadd.f32 %v4829_v16, %v1478_v38 }
 0x282   :  { %3466 = vmatpush3.bf16.msra.mxu1 %v3465_v51 }
 0x284   :  { %v1483_v58 = vpop.f32.mrb[50].mxu0 }
 0x285   :  { %v1484_v62 = vadd.f32 %v4829_v16, %v1483_v58  ;;  %v3168_v26 = vpop.f32.mrb[51].mxu0 }
 0x287   :  { %v3467_v45 = vpack.c.bf16 %v1484_v62, %v1479_v41 }
 0x288   :  { %v1488_v44 = vpop.f32.mrb[52].mxu0 }
 0x289   :  { %3468 = vmatprep.subr.bf16.mxu1 %v3467_v45  ;;  %v3171_v5 = vpop.f32.mrb[53].mxu0  ;;  %v1489_v10 = vadd.f32 %v4829_v16, %v1488_v44 }
 0x28a   :  { %3470 = vmatpush3.bf16.msra.mxu1 %v3469_v56 }
 0x28c   :  { %v1493_v49 = vpop.f32.mrb[54].mxu0 }
 0x28d   :  { %v1494_v30 = vadd.f32 %v4829_v16, %v1493_v49  ;;  %v3174_v42 = vpop.f32.mrb[55].mxu0 }
 0x28f   :  { %v3471_v51 = vpack.c.bf16 %v1494_v30, %v1489_v10 }
 0x290   :  { %v1498_v53 = vpop.f32.mrb[56].mxu0 }
 0x291   :  { %3472 = vmatprep.subr.bf16.mxu1 %v3471_v51  ;;  %v3177_v55 = vpop.f32.mrb[57].mxu0  ;;  %v1499_v61 = vadd.f32 %v4829_v16, %v1498_v53 }
 0x292   :  { %3474 = vmatpush3.bf16.msra.mxu1 %v3473_v48 }
 0x294   :  { %v1503_v35 = vpop.f32.mrb[58].mxu0 }
 0x295   :  { %v1504_v36 = vadd.f32 %v4829_v16, %v1503_v35  ;;  %v3180_v39 = vpop.f32.mrb[59].mxu0 }
 0x297   :  { %v3475_v56 = vpack.c.bf16 %v1504_v36, %v1499_v61 }
 0x298   :  { %v1508_v59 = vpop.f32.mrb[60].mxu0 }
 0x299   :  { %3476 = vmatprep.subr.bf16.mxu1 %v3475_v56  ;;  %v3183_v63 = vpop.f32.mrb[61].mxu0  ;;  %v1509_v1 = vadd.f32 %v4829_v16, %v1508_v59 }
 0x29a   :  { %3478 = vmatpush3.bf16.msra.mxu1 %v3477_v50 }
 0x29c   :  { %v1513_v4 = vpop.f32.mrb[62].mxu0 }
 0x29d   :  { %v1514_v43 = vadd.f32 %v4829_v16, %v1513_v4  ;;  %v3186_v40 = vpop.f32.mrb[63].mxu0 }
 0x29f   :  { %v3479_v48 = vpack.c.bf16 %v1514_v43, %v1509_v1 }
 0x2a0   :  { %v1518_v3 = vpop.f32.mrb[64].mxu0 }
 0x2a1   :  { %3480 = vmatprep.subr.bf16.mxu1 %v3479_v48  ;;  %v3189_v11 = vpop.f32.mrb[65].mxu0  ;;  %v1519_v12 = vadd.f32 %v4829_v16, %v1518_v3 }
 0x2a2   :  { %3482 = vmatpush3.bf16.msra.mxu1 %v3481_v60 }
 0x2a4   :  { %v1523_v15 = vpop.f32.mrb[66].mxu0 }
 0x2a5   :  { %v1524_v14 = vadd.f32 %v4829_v16, %v1523_v15  ;;  %v3192_v52 = vpop.f32.mrb[67].mxu0 }
 0x2a7   :  { %v3483_v50 = vpack.c.bf16 %v1524_v14, %v1519_v12 }
 0x2a8   :  { %v1528_v13 = vpop.f32.mrb[68].mxu0 }
 0x2a9   :  { %3484 = vmatprep.subr.bf16.mxu1 %v3483_v50  ;;  %v3195_v17 = vpop.f32.mrb[69].mxu0  ;;  %v1529_v23 = vadd.f32 %v4829_v16, %v1528_v13  ;;  %v1612_v13 = vld [vmem:[%s5531_s8] sm:$0xff] }
 0x2aa   :  { %3486 = vmatpush3.bf16.msra.mxu1 %v3485_v9  ;;  %v1615_v17 = vld [vmem:[%s5531_s8 + $0x18] sm:$0xff] }
 0x2ab   :  { %3511 = vmatprep.subr.bf16.mxu1 %v3657_v47 }
 0x2ac   :  { %v1533_v54 = vpop.f32.mrb[70].mxu0 }
 0x2ad   :  { %v1534_v57 = vadd.f32 %v4829_v16, %v1533_v54  ;;  %v3198_v60 = vpop.f32.mrb[71].mxu0  ;;  %v1613_v54 = vld [vmem:[%s5531_s8 + $0x8] sm:$0xff] }
 0x2af   :  { %v3488_v18 = vpack.c.bf16 %v1534_v57, %v1529_v23  ;;  %v1614_v23 = vld [vmem:[%s5531_s8 + $0x10] sm:$0xff] }
 0x2b0   :  { %v1538_v19 = vpop.f32.mrb[72].mxu0 }
 0x2b1   :  { %v3201_v20 = vpop.f32.mrb[73].mxu0  ;;  %3489 = vmatpush1.bf16.msra.mxu0 %v3488_v18  ;;  %v1539_v22 = vadd.f32 %v4829_v16, %v1538_v19 }
 0x2b2   :  { %3490 = vmatprep.subr.bf16.mxu0 %v3657_v47 }
 0x2b4   :  { %v1543_v24 = vpop.f32.mrb[74].mxu0 }
 0x2b5   :  { %v1544_v2 = vadd.f32 %v4829_v16, %v1543_v24  ;;  %v3204_v7 = vpop.f32.mrb[75].mxu0 }
 0x2b7   :  { %v3491_v9 = vpack.c.bf16 %v1544_v2, %v1539_v22 }
 0x2b8   :  { %v1548_v29 = vpop.f32.mrb[76].mxu0 }
 0x2b9   :  { %v3207_v31 = vpop.f32.mrb[77].mxu0  ;;  %3492 = vmatpush1.bf16.msra.mxu0 %v3491_v9  ;;  %v1549_v37 = vadd.f32 %v4829_v16, %v1548_v29 }
 0x2ba   :  { %3493 = vmatprep.subr.bf16.mxu0 %v3657_v47  ;;  %v2070_v31 = vand.u32 127, %v430_v6 }
 0x2bc   :  { %v1553_v25 = vpop.f32.mrb[78].mxu0 }
 0x2bd   :  { %v1554_v27 = vadd.f32 %v4829_v16, %v1553_v25  ;;  %v3210_v28 = vpop.f32.mrb[79].mxu0  ;;  %v2052_v25 = vadd.s32 256, %v4358_v8 }
 0x2bf   :  { %v3494_v32 = vpack.c.bf16 %v1554_v27, %v1549_v37  ;;  %v4968_v27 = vmul.u32 8, %v2070_v31  ;;  %v2067_v31 = vadd.s32 376, %v4358_v8 }
 0x2c0   :  { %v1558_v46 = vpop.f32.mrb[80].mxu0 }
 0x2c1   :  { %v3213_v33 = vpop.f32.mrb[81].mxu0  ;;  %3495 = vmatpush1.bf16.msra.mxu0 %v3494_v32  ;;  %v1559_v34 = vadd.f32 %v4829_v16, %v1558_v46 }
 0x2c2   :  { %3496 = vmatprep.subr.bf16.mxu0 %v3657_v47 }
 0x2c4   :  { %v1563_v38 = vpop.f32.mrb[82].mxu0 }
 0x2c5   :  { %v1564_v21 = vadd.f32 %v4829_v16, %v1563_v38  ;;  %v3216_v41 = vpop.f32.mrb[83].mxu0 }
 0x2c7   :  { %v3497_v58 = vpack.c.bf16 %v1564_v21, %v1559_v34  ;;  %v2053_v34 = vadd.s32 264, %v4358_v8 }
 0x2c8   :  { %v1568_v62 = vpop.f32.mrb[84].mxu0 }
 0x2c9   :  { %v3219_v26 = vpop.f32.mrb[85].mxu0  ;;  %3498 = vmatpush1.bf16.msra.mxu0 %v3497_v58  ;;  %v1569_v45 = vadd.f32 %v4829_v16, %v1568_v62  ;;  %v2104_v62 = vsub.s32 %v2052_v25, %v4968_v27  ;;  %v2105_v6 = vsub.s32 %v2053_v34, %v4968_v27  ;;  %v5600_v25 = vmov 0 }
 0x2ca   :  { %3499 = vmatprep.subr.bf16.mxu0 %v3657_v47  ;;  %v2054_v26 = vadd.s32 272, %v4358_v8  ;;  %v2044_v34 = vadd.s32 192, %v4358_v8 }
 0x2cb   :  { %vm2153_vm4 = vcmp.ge.s32.totalorder %v2104_v62, 0  ;;  %vm2202_vm5 = vcmp.lt.s32.totalorder %v2104_v62, 8  ;;  %vm2154_vm6 = vcmp.ge.s32.totalorder %v2105_v6, 0  ;;  %vm2203_vm7 = vcmp.lt.s32.totalorder %v2105_v6, 8  ;;  %v1932_v62 = vld [vmem:[%s5535_s12 + $0x20] sm:$0xff]  ;;  %v1933_v6 = vld [vmem:[%s5535_s12 + $0x28] sm:$0xff] }
 0x2cc   :  { %v1573_v44 = vpop.f32.mrb[86].mxu0  ;;  %vm4978_vm8 = vmand %vm2153_vm4, %vm2202_vm5 }
 0x2cd   :  { %v1574_v5 = vadd.f32 %v4829_v16, %v1573_v44  ;;  %v3222_v10 = vpop.f32.mrb[87].mxu0  ;;  %v2106_v44 = vsub.s32 %v2054_v26, %v4968_v27  ;;  %vm4983_vm9 = vmand %vm2154_vm6, %vm2203_vm7 }
 0x2ce   :  { %v2056_v10 = vadd.s32 288, %v4358_v8  ;;  %vm3568_vm14 = vmpackc.low %vm4983_vm9, %vm4978_vm8 }
 0x2cf   :  { %v3500_v49 = vpack.c.bf16 %v1574_v5, %v1569_v45  ;;  %v2055_v45 = vadd.s32 280, %v4358_v8  ;;  %vm2155_vm10 = vcmp.ge.s32.totalorder %v2106_v44, 0  ;;  %vm2204_vm11 = vcmp.lt.s32.totalorder %v2106_v44, 8 }
 0x2d0   :  { %v1578_v30 = vpop.f32.mrb[88].mxu0  ;;  %vm5002_vm15 = vmand %vm2155_vm10, %vm2204_vm11  ;;  %v3518_v44 = vpack.c.bf16 %v1933_v6, %v1932_v62  ;;  %v5608_v6 = vmov 0 }
 0x2d1   :  { %v3225_v42 = vpop.f32.mrb[89].mxu0  ;;  %3501 = vmatpush1.bf16.msra.mxu0 %v3500_v49  ;;  %v1579_v51 = vadd.f32 %v4829_v16, %v1578_v30  ;;  %v2107_v5 = vsub.s32 %v2055_v45, %v4968_v27  ;;  %v2057_v30 = vadd.s32 296, %v4358_v8 }
 0x2d2   :  { %3502 = vmatprep.subr.bf16.mxu0 %v3657_v47  ;;  %v1937_v42 = vld [vmem:[%s5535_s12 + $0x48] sm:$0xff] }
 0x2d3   :  { %vm2156_vm12 = vcmp.ge.s32.totalorder %v2107_v5, 0  ;;  %vm2205_vm13 = vcmp.lt.s32.totalorder %v2107_v5, 8  ;;  %v1934_v5 = vld [vmem:[%s5535_s12 + $0x30] sm:$0xff] }
 0x2d4   :  { %v1583_v53 = vpop.f32.mrb[90].mxu0  ;;  %vm5010_vm0 = vmand %vm2156_vm12, %vm2205_vm13 }
 0x2d5   :  { %v1584_v55 = vadd.f32 %v4829_v16, %v1583_v53  ;;  %v3228_v61 = vpop.f32.mrb[91].mxu0  ;;  %v2059_v53 = vadd.s32 312, %v4358_v8 }
 0x2d6   :  { %v2108_v61 = vsub.s32 %v2056_v10, %v4968_v27  ;;  %v1935_v10 = vld [vmem:[%s5535_s12 + $0x38] sm:$0xff] }
 0x2d7   :  { %v3503_v35 = vpack.c.bf16 %v1584_v55, %v1579_v51  ;;  %v2058_v51 = vadd.s32 304, %v4358_v8  ;;  %v3521_v49 = vpack.c.bf16 %v1935_v10, %v1934_v5  ;;  %v2096_v5 = vsub.s32 %v2044_v34, %v4968_v27 }
 0x2d8   :  { %v1588_v36 = vpop.f32.mrb[92].mxu0  ;;  %vm2157_vm2 = vcmp.ge.s32.totalorder %v2108_v61, 0  ;;  %vm2206_vm4 = vcmp.lt.s32.totalorder %v2108_v61, 8  ;;  %v1938_v61 = vld [vmem:[%s5535_s12 + $0x50] sm:$0xff]  ;;  %v5675_v34 = vmov 0 }
 0x2d9   :  { %v3231_v39 = vpop.f32.mrb[93].mxu0  ;;  %3504 = vmatpush1.bf16.msra.mxu0 %v3503_v35  ;;  %v1589_v56 = vadd.f32 %v4829_v16, %v1588_v36  ;;  %v2109_v36 = vsub.s32 %v2057_v30, %v4968_v27  ;;  %vm5039_vm11 = vmand %vm2157_vm2, %vm2206_vm4  ;;  %v1936_v30 = vld [vmem:[%s5535_s12 + $0x40] sm:$0xff] }
 0x2da   :  { %3505 = vmatprep.subr.bf16.mxu0 %v3657_v47 }
 0x2db   :  { %vm2158_vm5 = vcmp.ge.s32.totalorder %v2109_v36, 0  ;;  %vm2207_vm6 = vcmp.lt.s32.totalorder %v2109_v36, 8  ;;  %v1939_v36 = vld [vmem:[%s5535_s12 + $0x58] sm:$0xff] }
 0x2dc   :  { %v1593_v59 = vpop.f32.mrb[94].mxu0  ;;  %vm5046_vm9 = vmand %vm2158_vm5, %vm2207_vm6 }
 0x2dd   :  { %v1594_v63 = vadd.f32 %v4829_v16, %v1593_v59  ;;  %v3234_v1 = vpop.f32.mrb[95].mxu0 }
 0x2df   :  { %v3506_v4 = vpack.c.bf16 %v1594_v63, %v1589_v56  ;;  %v2110_v63 = vsub.s32 %v2058_v51, %v4968_v27  ;;  %v3524_v51 = vpack.c.bf16 %v1937_v42, %v1936_v30  ;;  %v3527_v56 = vpack.c.bf16 %v1939_v36, %v1938_v61 }
 0x2e0   :  { %v1598_v43 = vpop.f32.mrb[96].mxu0  ;;  %v2028_v42 = vadd.s32 64, %v4358_v8  ;;  %v5616_v61 = vmov 0  ;;  %v2029_v36 = vadd.s32 72, %v4358_v8 }
 0x2e1   :  { %v3237_v40 = vpop.f32.mrb[97].mxu0  ;;  %3507 = vmatpush1.bf16.msra.mxu0 %v3506_v4  ;;  %v1599_v48 = vadd.f32 %v4829_v16, %v1598_v43  ;;  %v2111_v43 = vsub.s32 %v2059_v53, %v4968_v27  ;;  %vm2159_vm7 = vcmp.ge.s32.totalorder %v2110_v63, 0  ;;  %vm2208_vm10 = vcmp.lt.s32.totalorder %v2110_v63, 8  ;;  %v1942_v4 = vld [vmem:[%s5535_s12 + $0x70] sm:$0xff] }
 0x2e2   :  { %3508 = vmatprep.subr.bf16.mxu0 %v3657_v47  ;;  %v2060_v40 = vadd.s32 320, %v4358_v8  ;;  %vm5051_vm12 = vmand %vm2159_vm7, %vm2208_vm10  ;;  %v3660_v53 = vmov 1.0  }
 0x2e3   :  { %vm2160_vm8 = vcmp.ge.s32.totalorder %v2111_v43, 0 }
 0x2e4   :  { %v1603_v3 = vpop.f32.mrb[98].mxu0 }
 0x2e5   :  { %v1604_v11 = vadd.f32 %v4829_v16, %v1603_v3  ;;  %v3240_v12 = vpop.f32.mrb[99].mxu0  ;;  %v2061_v3 = vadd.s32 328, %v4358_v8 }
 0x2e6   :  { %v2062_v12 = vadd.s32 336, %v4358_v8 }
 0x2e7   :  { %v3509_v15 = vpack.c.bf16 %v1604_v11, %v1599_v48 }
 0x2e8   :  { %v1608_v14 = vpop.f32.mrb[100].mxu0 }
 0x2e9   :  { %v1609_v52 = vadd.f32 %v4829_v16, %v1608_v14  ;;  %v3243_v50 = vpop.f32.mrb[101].mxu0  ;;  %3510 = vmatpush1.bf16.msra.mxu0 %v3509_v15  ;;  %v3659_v15 = vmov 1.0|1.0  }
 0x2ea   :  { %1889 = vmatprep.subr.mxu0 %v3656_v0  ;;  %v2023_v50 = vadd.s32 24, %v4358_v8 }
 0x2ed   :  { %1890 = vmatpush1.msra.mxu0 %v1609_v52  ;;  %v2063_v52 = vadd.s32 344, %v4358_v8 }
 0x2ee   :  { %3567 = vmatprep.subr.bf16.mxu0 %v3657_v47 }
 0x2f0   :  { %v1753_v16 = vpop.f32.mrb[102].mxu0 }
 0x2f1   :  { %v1682_v57 = vpop.f32.mrb[100].mxu1  ;;  %v1755_v60 = vpop.f32.mrb[103].mxu0  ;;  %v1754_v22 = vadd.f32 %v1753_v16, %v1614_v23  ;;  %v2113_v23 = vsub.s32 %v2061_v3, %v4968_v27  ;;  %v2040_v16 = vadd.s32 160, %v4358_v8 }
 0x2f2   :  { %v1683_v18 = vadd.f32 %v1682_v57, %v1612_v13  ;;  %v1756_v19 = vadd.f32 %v1755_v60, %v1615_v17  ;;  %v1684_v20 = vpop.f32.mrb[101].mxu1  ;;  %v2112_v13 = vsub.s32 %v2060_v40, %v4968_v27  ;;  %v2115_v60 = vsub.s32 %v2063_v52, %v4968_v27 }
 0x2f3   :  { %v1685_v24 = vadd.f32 %v1684_v20, %v1613_v54  ;;  %v2114_v54 = vsub.s32 %v2062_v12, %v4968_v27  ;;  %vm2162_vm2 = vcmp.ge.s32.totalorder %v2113_v23, 0  ;;  %vm2211_vm4 = vcmp.lt.s32.totalorder %v2113_v23, 8 }
 0x2f4   :  { %v1759_v2 = vsel %vm1758_vm3, %v1756_v19, -inf  ;;  %vm2164_vm10 = vcmp.ge.s32.totalorder %v2115_v60, 0  ;;  %v2039_v12 = vadd.s32 152, %v4358_v8  ;;  %v2072_v52 = vsub.s32 %v4358_v8, %v4968_v27 }
 0x2f5   :  { %v1760_v7 = vmax.f32 %v1683_v18, %v1685_v24  ;;  %v1761_v9 = vmax.f32 %v1754_v22, %v1759_v2  ;;  %vm2163_vm6 = vcmp.ge.s32.totalorder %v2114_v54, 0  ;;  %v2041_v57 = vadd.s32 168, %v4358_v8 }
 0x2f6   :  { %v2091_v23 = vsub.s32 %v2039_v12, %v4968_v27  ;;  %v5596_v2 = vmov 0  ;;  %v2031_v12 = vadd.s32 88, %v4358_v8 }
 0x2f7   :  { %v1762_v29 = vmax.f32 %v1760_v7, %v1761_v9  ;;  %v2066_v9 = vadd.s32 368, %v4358_v8 }
 0x2f9   :  { %1763 = vmax.xlane.f32.xlu0 %v1762_v29  ;;  %v5598_v29 = vmov 0 }
 0x386   :  { %v1764_v37 = vpop.xlane.xlu0 %1763 }
 0x387   :  { %v1765_v28 = vsub.f32 %v1683_v18, %v1764_v37  ;;  %v1766_v32 = vsub.f32 %v1685_v24, %v1764_v37  ;;  %v1767_v46 = vsub.f32 %v1754_v22, %v1764_v37  ;;  %v1768_v33 = vsub.f32 %v1756_v19, %v1764_v37 }
 0x388   :  { %v2064_v18 = vadd.s32 352, %v4358_v8  ;;  %v2065_v19 = vadd.s32 360, %v4358_v8  ;;  %v2118_v37 = vsub.s32 %v2066_v9, %v4968_v27  ;;  %v2042_v24 = vadd.s32 176, %v4358_v8 }
 0x389   :  { %v1769_v38 = vmul.f32 1.442695, %v1765_v28  ;;  %v1771_v21 = vmul.f32 1.442695, %v1766_v32  ;;  %v1773_v41 = vmul.f32 1.442695, %v1767_v46  ;;  %v2119_v28 = vsub.s32 %v2067_v31, %v4968_v27 }
 0x38a   :  { %v1775_v58 = vmul.f32 1.442695, %v1768_v33  ;;  %v2116_v22 = vsub.s32 %v2064_v18, %v4968_v27  ;;  %v2117_v7 = vsub.s32 %v2065_v19, %v4968_v27  ;;  %v1928_v32 = vld [vmem:[%s5535_s12] sm:$0xff]  ;;  %v1929_v46 = vld [vmem:[%s5535_s12 + $0x8] sm:$0xff]  ;;  %v1930_v33 = vld [vmem:[%s5535_s12 + $0x10] sm:$0xff]  ;;  %v2024_v18 = vadd.s32 32, %v4358_v8 }
 0x38b   :  { %3619 = vpow2.f32 %v1769_v38  ;;  %v3512_v38 = vpack.c.bf16 %v1929_v46, %v1928_v32  ;;  %v2025_v19 = vadd.s32 40, %v4358_v8  ;;  %v2043_v9 = vadd.s32 184, %v4358_v8 }
 0x38c   :  { %3621 = vpow2.f32 %v1771_v21  ;;  %v1931_v21 = vld [vmem:[%s5535_s12 + $0x18] sm:$0xff]  ;;  %v2076_v31 = vsub.s32 %v2024_v18, %v4968_v27  ;;  %v2027_v32 = vadd.s32 56, %v4358_v8  ;;  %v5602_v46 = vmov 0 }
 0x38d   :  { %3623 = vpow2.f32 %v1773_v41  ;;  %v2068_v41 = vadd.s32 384, %v4358_v8  ;;  %v2033_v18 = vadd.s32 104, %v4358_v8 }
 0x38e   :  { %3625 = vpow2.f32 %v1775_v58  ;;  %v3515_v58 = vpack.c.bf16 %v1931_v21, %v1930_v33  ;;  %v2094_v33 = vsub.s32 %v2042_v24, %v4968_v27  ;;  %v2095_v21 = vsub.s32 %v2043_v9, %v4968_v27 }
 0x38f   :  { %v2120_v45 = vsub.s32 %v2068_v41, %v4968_v27  ;;  %v2045_v41 = vadd.s32 200, %v4358_v8  ;;  %v2079_v26 = vsub.s32 %v2027_v32, %v4968_v27  ;;  %v5652_v24 = vmov 0 }
 0x390   :  { %v5654_v9 = vmov 0  ;;  %v2034_v32 = vadd.s32 112, %v4358_v8 }
 0x391   :  { %v2097_v30 = vsub.s32 %v2045_v41, %v4968_v27 }
 0x395   :  { %v4989_v55 = vpop.eup %3619 }
 0x396   :  { %v4992_v35 = vpop.eup %3621 }
 0x397   :  { %v4999_v39 = vpop.eup %3623  ;;  %1851 = vmatprep.mubr.f32.mxu1 %v4992_v35  ;;  %v1777_v59 = vadd.f32 %v4992_v35, %v4989_v55 }
 0x398   :  { %v3626_v1 = vpop.eup %3625  ;;  %1852 = vmatmul.mubr.f32.vlgmr.msra.gmra.mrb[102].mxu1 %v4989_v55 }
 0x399   :  { %2579 = vmatprep.mubr.msk.f32.mxu0 %vm1758_vm3, %v3626_v1  ;;  %v1778_v48 = vadd.f32 %v4999_v39, %v1777_v59  ;;  %3276 = vmatprep.mubr.msk.f32.mxu1 %vm3658_vm1, %v3656_v0  ;;  %v1779_v11 = vsel %vm1758_vm3, %v3626_v1, 0.0  ;;  %vm3571_vm1 = vmpackc.low %vm5010_vm0, %vm5002_vm15  ;;  %vm2161_vm15 = vcmp.ge.s32.totalorder %v2112_v13, 0  ;;  %vm2210_vm0 = vcmp.lt.s32.totalorder %v2112_v13, 8  ;;  %v1941_v59 = vld [vmem:[%s5535_s12 + $0x68] sm:$0xff] }
 0x39a   :  { %1922 = vmatmul.mubr.f32.vlgmr.msra.gmra.mrb[104].mxu0 %v4999_v39  ;;  %vm5074_vm7 = vmand %vm2161_vm15, %vm2210_vm0  ;;  %vm2166_vm0 = vcmp.ge.s32.totalorder %v2117_v7, 0  ;;  %3513 = vmatpush3.bf16.msra.mxu1 %v3512_v38  ;;  %v5604_v38 = vmov 0 }
 0x39b   :  { %3569 = vmatpush1.bf16.msk.msra.mxu0 %vm3568_vm14, %v3659_v15  ;;  %2630 = vmatprep.mubr.msk.f32.mxu0 %vm1758_vm3, %v3626_v1  ;;  %v1780_v14 = vadd.f32 %v1779_v11, %v1778_v48  ;;  %vm2209_vm3 = vcmp.lt.s32.totalorder %v2111_v43, 8  ;;  %vm3574_vm14 = vmpackc.low %vm5046_vm9, %vm5039_vm11  ;;  %vm2213_vm11 = vcmp.lt.s32.totalorder %v2115_v60, 8  ;;  %v2036_v1 = vadd.s32 128, %v4358_v8  ;;  %v1943_v43 = vld [vmem:[%s5535_s12 + $0x78] sm:$0xff] }
 0x39c   :  { %3570 = vmatprep.subr.bf16.mxu0 %v3657_v47  ;;  %vm5057_vm13 = vmand %vm2160_vm8, %vm2209_vm3  ;;  %3514 = vmatprep.subr.bf16.mxu1 %v3657_v47  ;;  %v3533_v40 = vpack.c.bf16 %v1943_v43, %v1942_v4  ;;  %v2038_v11 = vadd.s32 144, %v4358_v8  ;;  %v2075_v60 = vsub.s32 %v2023_v50, %v4968_v27  ;;  %v5626_v43 = vmov 0 }
 0x39d   :  { %1781 = vadd.xlane.f32.xlu0 %v1780_v14  ;;  %vm3577_vm5 = vmpackc.low %vm5057_vm13, %vm5051_vm12  ;;  %vm2165_vm12 = vcmp.ge.s32.totalorder %v2116_v22, 0  ;;  %vm2214_vm13 = vcmp.lt.s32.totalorder %v2116_v22, 8  ;;  %v2088_v48 = vsub.s32 %v2036_v1, %v4968_v27  ;;  %v2022_v14 = vadd.s32 16, %v4358_v8 }
 0x39e   :  { %vm5080_vm8 = vmand %vm2162_vm2, %vm2211_vm4  ;;  %vm2215_vm2 = vcmp.lt.s32.totalorder %v2117_v7, 8  ;;  %3516 = vmatpush3.bf16.msra.mxu1 %v3515_v58  ;;  %v2090_v17 = vsub.s32 %v2038_v11, %v4968_v27  ;;  %v2092_v22 = vsub.s32 %v2040_v16, %v4968_v27  ;;  %v2093_v7 = vsub.s32 %v2041_v57, %v4968_v27 }
 0x39f   :  { %3572 = vmatpush1.bf16.msk.msra.mxu0 %vm3571_vm1, %v3659_v15  ;;  %vm2212_vm1 = vcmp.lt.s32.totalorder %v2114_v54, 8  ;;  %vm5090_vm9 = vmand %vm2164_vm10, %vm2213_vm11  ;;  %vm2217_vm10 = vcmp.lt.s32.totalorder %v2119_v28, 8  ;;  %3517 = vmatprep.subr.bf16.mxu1 %v3657_v47  ;;  %v2074_v54 = vsub.s32 %v2022_v14, %v4968_v27  ;;  %v5606_v58 = vmov 0 }
 0x3a0   :  { %3573 = vmatprep.subr.bf16.mxu0 %v3657_v47  ;;  %vm5084_vm3 = vmand %vm2163_vm6, %vm2212_vm1  ;;  %vm2167_vm6 = vcmp.ge.s32.totalorder %v2118_v37, 0  ;;  %vm2216_vm1 = vcmp.lt.s32.totalorder %v2118_v37, 8  ;;  %v2026_v37 = vadd.s32 48, %v4358_v8  ;;  %v5623_v1 = vmov 0 }
 0x3a1   :  { %vm3583_vm15 = vmpackc.low %vm5090_vm9, %vm5084_vm3  ;;  %v2081_v11 = vsub.s32 %v2029_v36, %v4968_v27  ;;  %v5631_v14 = vmov 0  ;;  %v5633_v50 = vmov 0  ;;  %v2049_v16 = vadd.s32 232, %v4358_v8 }
 0x3a2   :  { %vm5106_vm4 = vmand %vm2165_vm12, %vm2214_vm13  ;;  %vm2169_vm12 = vcmp.ge.s32.totalorder %v2120_v45, 0  ;;  %vm2218_vm13 = vcmp.lt.s32.totalorder %v2120_v45, 8  ;;  %3519 = vmatpush3.bf16.msra.mxu1 %v3518_v44  ;;  %v2078_v62 = vsub.s32 %v2026_v37, %v4968_v27  ;;  %v2032_v57 = vadd.s32 96, %v4358_v8 }
 0x3a3   :  { %3575 = vmatpush1.bf16.msk.msra.mxu0 %vm3574_vm14, %v3659_v15  ;;  %vm3580_vm14 = vmpackc.low %vm5080_vm8, %vm5074_vm7  ;;  %vm2168_vm7 = vcmp.ge.s32.totalorder %v2119_v28, 0  ;;  %3520 = vmatprep.subr.bf16.mxu1 %v3657_v47  ;;  %v2077_v28 = vsub.s32 %v2025_v19, %v4968_v27  ;;  %v5650_v19 = vmov 0  ;;  %v2085_v37 = vsub.s32 %v2033_v18, %v4968_v27 }
 0x3a4   :  { %3576 = vmatprep.subr.bf16.mxu0 %v3657_v47  ;;  %vm5148_vm8 = vmand %vm2167_vm6, %vm2216_vm1 }
 0x3a5   :  { %vm2266_vm3 = vmand %vm2168_vm7, %vm2217_vm10  ;;  %vm2121_vm7 = vcmp.ge.s32.totalorder %v2072_v52, 0  ;;  %vm2170_vm10 = vcmp.lt.s32.totalorder %v2072_v52, 8 }
 0x3a6   :  { %vm3589_vm9 = vmpackc.low %vm2266_vm3, %vm5148_vm8  ;;  %3522 = vmatpush3.bf16.msra.mxu1 %v3521_v49  ;;  %vm2139_vm3 = vcmp.ge.s32.totalorder %v2090_v17, 0  ;;  %v5613_v49 = vmov 0 }
 0x3a7   :  { %3578 = vmatpush1.bf16.msk.msra.mxu0 %vm3577_vm5, %v3659_v15  ;;  %vm5122_vm5 = vmand %vm2166_vm0, %vm2215_vm2  ;;  %3523 = vmatprep.subr.bf16.mxu1 %v3657_v47  ;;  %vm2186_vm2 = vcmp.lt.s32.totalorder %v2088_v48, 8 }
 0x3a8   :  { %3579 = vmatprep.subr.bf16.mxu0 %v3657_v47  ;;  %vm3586_vm11 = vmpackc.low %vm5122_vm5, %vm5106_vm4 }
 0x3aa   :  { %3525 = vmatpush3.bf16.msra.mxu1 %v3524_v51 }
 0x3ab   :  { %3581 = vmatpush1.bf16.msk.msra.mxu0 %vm3580_vm14, %v3659_v15  ;;  %vm2267_vm14 = vmand %vm2169_vm12, %vm2218_vm13  ;;  %3526 = vmatprep.subr.bf16.mxu1 %v3657_v47  ;;  %vm2188_vm12 = vcmp.lt.s32.totalorder %v2090_v17, 8 }
 0x3ac   :  { %3582 = vmatprep.subr.bf16.mxu0 %v3657_v47  ;;  %vm5219_vm13 = vmand %vm2121_vm7, %vm2170_vm10  ;;  %vm2141_vm7 = vcmp.ge.s32.totalorder %v2092_v22, 0  ;;  %vm2190_vm10 = vcmp.lt.s32.totalorder %v2092_v22, 8  ;;  %v2050_v22 = vadd.s32 240, %v4358_v8 }
 0x3ad   :  { %v5597_v2 = vsel %vm5219_vm13, 4294967295, %v5596_v2  ;;  %vm2175_vm13 = vcmp.lt.s32.totalorder %v2077_v28, 8 }
 0x3ae   :  { %3528 = vmatpush3.bf16.msra.mxu1 %v3527_v56 }
 0x3af   :  { %3584 = vmatpush1.bf16.msk.msra.mxu0 %vm3583_vm15, %v3659_v15  ;;  %3529 = vmatprep.subr.bf16.mxu1 %v3657_v47  ;;  %vm2137_vm15 = vcmp.ge.s32.totalorder %v2088_v48, 0  ;;  %v2030_v48 = vadd.s32 80, %v4358_v8 }
 0x3b0   :  { %3585 = vmatprep.subr.bf16.mxu0 %v3657_v47  ;;  %vm2235_vm5 = vmand %vm2137_vm15, %vm2186_vm2  ;;  %vm2123_vm15 = vcmp.ge.s32.totalorder %v2074_v54, 0  ;;  %vm2124_vm2 = vcmp.ge.s32.totalorder %v2075_v60, 0 }
 0x3b1   :  { %v2082_v17 = vsub.s32 %v2030_v48, %v4968_v27 }
 0x3b3   :  { %3587 = vmatpush1.bf16.msk.msra.mxu0 %vm3586_vm11, %v3659_v15 }
 0x3b4   :  { %3588 = vmatprep.subr.bf16.mxu0 %v3657_v47 }
 0x3b7   :  { %3590 = vmatpush1.bf16.msk.msra.mxu0 %vm3589_vm9, %v3659_v15  ;;  %vm2140_vm9 = vcmp.ge.s32.totalorder %v2091_v23, 0 }
 0x3b8   :  { %2419 = vmatprep.subr.mxu0 %v3656_v0  ;;  %v1940_v0 = vld [vmem:[%s5535_s12 + $0x60] sm:$0xff] }
 0x3b9   :  { %v3530_v63 = vpack.c.bf16 %v1941_v59, %v1940_v0  ;;  %v5619_v0 = vmov 0  ;;  %v2046_v59 = vadd.s32 208, %v4358_v8 }
 0x3bb   :  { %2629 = vmatpush1.msk.msra.mxu0 %vm2267_vm14, %v3660_v53  ;;  %3531 = vmatpush3.bf16.msra.mxu1 %v3530_v63  ;;  %vm2189_vm14 = vcmp.lt.s32.totalorder %v2091_v23, 8  ;;  %v2098_v52 = vsub.s32 %v2046_v59, %v4968_v27  ;;  %v2048_v23 = vadd.s32 224, %v4358_v8 }
 0x3bc   :  { %2452 = vmatmul.mubr.f32.vlgmr.msra.gmra.mrb[106].mxu0 %v4999_v39  ;;  %v2037_v39 = vadd.s32 136, %v4358_v8  ;;  %3532 = vmatprep.subr.bf16.mxu1 %v3657_v47  ;;  %v2021_v47 = vadd.s32 8, %v4358_v8 }
 0x3be   :  { %v2089_v3 = vsub.s32 %v2037_v39, %v4968_v27  ;;  %v2073_v13 = vsub.s32 %v2021_v47, %v4968_v27  ;;  %v2047_v39 = vadd.s32 216, %v4358_v8  ;;  %v5629_v47 = vmov 0 }
 0x3bf   :  { %3534 = vmatpush3.bf16.msra.mxu1 %v3533_v40  ;;  %v2080_v40 = vsub.s32 %v2028_v42, %v4968_v27 }
 0x3c0   :  { %vm2138_vm0 = vcmp.ge.s32.totalorder %v2089_v3, 0  ;;  %vm2187_vm4 = vcmp.lt.s32.totalorder %v2089_v3, 8  ;;  %vm2122_vm11 = vcmp.ge.s32.totalorder %v2073_v13, 0  ;;  %vm2171_vm8 = vcmp.lt.s32.totalorder %v2073_v13, 8 }
 0x3c1   :  { %vm2236_vm6 = vmand %vm2138_vm0, %vm2187_vm4  ;;  %vm2172_vm4 = vcmp.lt.s32.totalorder %v2074_v54, 8  ;;  %v2099_v13 = vsub.s32 %v2047_v39, %v4968_v27  ;;  %v5641_v54 = vmov 0 }
 0x3c2   :  { %vm3535_vm1 = vmpackc.low %vm2236_vm6, %vm2235_vm5  ;;  %vm2173_vm6 = vcmp.lt.s32.totalorder %v2075_v60, 8  ;;  %v5646_v60 = vmov 0 }
 0x3c3   :  { %3536 = vmatprep.subr.msk.bf16.mxu1 %vm3535_vm1, %v3659_v15  ;;  %vm5225_vm0 = vmand %vm2122_vm11, %vm2171_vm8 }
 0x3c4   :  { %v5599_v29 = vsel %vm5225_vm0, 4294967295, %v5598_v29  ;;  %vm5232_vm5 = vmand %vm2139_vm3, %vm2188_vm12  ;;  %vm2191_vm3 = vcmp.lt.s32.totalorder %v2093_v7, 8 }
 0x3c5   :  { %v5601_v25 = vsel %vm5232_vm5, 4294967295, %v5600_v25  ;;  %vm5239_vm1 = vmand %vm2140_vm9, %vm2189_vm14  ;;  %vm2125_vm14 = vcmp.ge.s32.totalorder %v2076_v31, 0  ;;  %vm2126_vm9 = vcmp.ge.s32.totalorder %v2077_v28, 0 }
 0x3c6   :  { %v5603_v46 = vsel %vm5239_vm1, 4294967295, %v5602_v46  ;;  %vm5246_vm11 = vmand %vm2123_vm15, %vm2172_vm4  ;;  %vm2174_vm15 = vcmp.lt.s32.totalorder %v2076_v31, 8  ;;  %vm2194_vm1 = vcmp.lt.s32.totalorder %v2096_v5, 8  ;;  %v5659_v31 = vmov 0 }
 0x3c7   :  { %v5605_v38 = vsel %vm5246_vm11, 4294967295, %v5604_v38  ;;  %vm5257_vm12 = vmand %vm2124_vm2, %vm2173_vm6  ;;  %vm5610_vm2 = vcmp.ge.s32.totalorder %v2093_v7, 0  ;;  %v2051_v7 = vadd.s32 248, %v4358_v8 }
 0x3c8   :  { %v5607_v58 = vsel %vm5257_vm12, 4294967295, %v5606_v58  ;;  %vm5267_vm8 = vmand %vm2141_vm7, %vm2190_vm10  ;;  %vm2192_vm12 = vcmp.lt.s32.totalorder %v2094_v33, 8  ;;  %vm5618_vm10 = vcmp.ge.s32.totalorder %v2094_v33, 0  ;;  %vm2146_vm7 = vcmp.ge.s32.totalorder %v2097_v30, 0 }
 0x3c9   :  { %v5609_v6 = vsel %vm5267_vm8, 4294967295, %v5608_v6  ;;  %vm5273_vm6 = vmand %vm5610_vm2, %vm2191_vm3  ;;  %vm5621_vm2 = vcmp.lt.s32.totalorder %v2095_v21, 8  ;;  %vm2145_vm3 = vcmp.ge.s32.totalorder %v2096_v5, 0  ;;  %v2103_v28 = vsub.s32 %v2051_v7, %v4968_v27 }
 0x3ca   :  { %vm5278_vm4 = vmand %vm2125_vm14, %vm2174_vm15  ;;  %vm2176_vm15 = vcmp.lt.s32.totalorder %v2078_v62, 8  ;;  %vm5622_vm14 = vcmp.ge.s32.totalorder %v2095_v21, 0  ;;  %v5668_v33 = vmov 0  ;;  %v5677_v21 = vmov 0 }
 0x3cb   :  { %v5614_v49 = vsel %vm5278_vm4, 4294967295, %v5613_v49  ;;  %vm5290_vm0 = vmand %vm2126_vm9, %vm2175_vm13  ;;  %vm2177_vm9 = vcmp.lt.s32.totalorder %v2079_v26, 8  ;;  %vm2195_vm13 = vcmp.lt.s32.totalorder %v2097_v30, 8  ;;  %vm5639_vm4 = vnez %v5601_v25 }
 0x3cc   :  { %v5617_v61 = vsel %vm5290_vm0, 4294967295, %v5616_v61  ;;  %vm5301_vm5 = vmand %vm5618_vm10, %vm2192_vm12  ;;  %vm5625_vm12 = vcmp.ge.s32.totalorder %v2078_v62, 0  ;;  %v2102_v25 = vsub.s32 %v2050_v22, %v4968_v27 }
 0x3cd   :  { %v5620_v0 = vsel %vm5301_vm5, 4294967295, %v5619_v0  ;;  %vm5308_vm11 = vmand %vm5622_vm14, %vm5621_vm2  ;;  %vm5628_vm14 = vcmp.ge.s32.totalorder %v2079_v26, 0  ;;  %vm2147_vm5 = vcmp.ge.s32.totalorder %v2098_v52, 0 }
 0x3ce   :  { %v5624_v1 = vsel %vm5308_vm11, 4294967295, %v5623_v1  ;;  %vm5316_vm10 = vmand %vm5625_vm12, %vm2176_vm15  ;;  %vm2196_vm11 = vcmp.lt.s32.totalorder %v2098_v52, 8 }
 0x3cf   :  { %v5627_v43 = vsel %vm5316_vm10, 4294967295, %v5626_v43  ;;  %vm5329_vm8 = vmand %vm5628_vm14, %vm2177_vm9  ;;  %vm5635_vm9 = vnez %v5599_v29  ;;  %vm5636_vm14 = vnez %v5597_v2  ;;  %vm5644_vm10 = vnez %v5605_v38 }
 0x3d0   :  { %v5630_v47 = vsel %vm5329_vm8, 4294967295, %v5629_v47  ;;  %vm5335_vm15 = vmand %vm2145_vm3, %vm2194_vm1  ;;  %vm2178_vm3 = vcmp.lt.s32.totalorder %v2080_v40, 8  ;;  %v2101_v2 = vsub.s32 %v2049_v16, %v4968_v27  ;;  %v2084_v29 = vsub.s32 %v2032_v57, %v4968_v27 }
 0x3d1   :  { %v5632_v14 = vsel %vm5335_vm15, 4294967295, %v5631_v14  ;;  %vm5340_vm12 = vmand %vm2146_vm7, %vm2195_vm13  ;;  %vm2129_vm7 = vcmp.ge.s32.totalorder %v2080_v40, 0  ;;  %vm5638_vm13 = vnez %v5603_v46  ;;  %vm2131_vm15 = vcmp.ge.s32.totalorder %v2082_v17, 0 }
 0x3d2   :  { %v5634_v50 = vsel %vm5340_vm12, 4294967295, %v5633_v50  ;;  %vm5637_vm2 = vmpackc.low %vm5635_vm9, %vm5636_vm14  ;;  %vm2130_vm9 = vcmp.ge.s32.totalorder %v2081_v11, 0  ;;  %vm2179_vm14 = vcmp.lt.s32.totalorder %v2081_v11, 8  ;;  %v2035_v46 = vadd.s32 120, %v4358_v8 }
 0x3d3   :  { %vm5640_vm0 = vmpackc.low %vm5638_vm13, %vm5639_vm4  ;;  %vm2148_vm4 = vcmp.ge.s32.totalorder %v2099_v13, 0  ;;  %vm2197_vm13 = vcmp.lt.s32.totalorder %v2099_v13, 8  ;;  %v2086_v38 = vsub.s32 %v2034_v32, %v4968_v27 }
 0x3d4   :  { %vm5385_vm1 = vmand %vm2130_vm9, %vm2179_vm14  ;;  %vm5662_vm14 = vnez %v5620_v0  ;;  %v2087_v41 = vsub.s32 %v2035_v46, %v4968_v27 }
 0x3d5   :  { %v5647_v60 = vsel %vm5385_vm1, 4294967295, %v5646_v60 }
 0x42a   :  { %v1782_v20 = vpop.xlane.xlu0 %1781 }
 0x42b   :  { %3627 = vrcp.f32 %v1782_v20  ;;  %v2100_v20 = vsub.s32 %v2048_v23, %v4968_v27 }
 0x435   :  { %v5313_v4 = vpop.eup %3627 }
 0x46b   :  { %v2828_v45 = vpop.f32.mrb[102].mxu1 }
 0x46c   :  { %v2829_v10 = vpop.f32.mrb[103].mxu1 }
 0x46d   :  { %v1923_v51 = vpop.f32.mrb[104].mxu0  ;;  %v2830_v53 = vadd.f32 %v2829_v10, %v2828_v45 }
 0x46e   :  { %v1925_v56 = vpop.f32.mrb[105].mxu0 }
 0x46f   :  { %v1924_v63 = vadd.f32 %v2830_v53, %v1923_v51 }
 0x471   :  { %v1927_v3 = vmul.f32 %v5313_v4, %v1924_v63 }
 0x473   :  { %3277 = vmatmul.mubr.f32.vlgmr.msra.gmra.mrb[104].mxu1 %v1927_v3 }
 0x474   :  { %3538 = vmatpush3.bf16.msk.msra.mxu1 %vm5637_vm2, %v3659_v15  ;;  %2381 = vmatprep.mubr.f32.mxu1 %v4992_v35  ;;  %v2083_v35 = vsub.s32 %v2031_v12, %v4968_v27  ;;  %vm5643_vm2 = vnez %v5607_v58  ;;  %v5682_v58 = vmov 0 }
 0x475   :  { %3540 = vmatprep.subr.msk.bf16.mxu1 %vm5640_vm0, %v3659_v15  ;;  %vm5374_vm0 = vmand %vm2129_vm7, %vm2178_vm3  ;;  %vm2180_vm7 = vcmp.lt.s32.totalorder %v2082_v17, 8  ;;  %vm5648_vm3 = vnez %v5609_v6  ;;  %v2580_v6 = vld [vmem:[%s5536_s13 + $0x3] ss:$0 sm:$0xff] }
 0x476   :  { %v5642_v54 = vsel %vm5374_vm0, 4294967295, %v5641_v54  ;;  %vm5645_vm8 = vmpackc.low %vm5643_vm2, %vm5644_vm10  ;;  %vm2181_vm10 = vcmp.lt.s32.totalorder %v2083_v35, 8 }
 0x477   :  { %vm5649_vm12 = vmpackc.low %vm5273_vm6, %vm5648_vm3  ;;  %vm2149_vm3 = vcmp.ge.s32.totalorder %v2100_v20, 0 }
 0x478   :  { %3542 = vmatpush3.bf16.msk.msra.mxu1 %vm5645_vm8, %v3659_v15  ;;  %vm5396_vm0 = vmand %vm2147_vm5, %vm2196_vm11  ;;  %vm2132_vm8 = vcmp.ge.s32.totalorder %v2083_v35, 0  ;;  %vm5656_vm5 = vnez %v5617_v61  ;;  %vm5657_vm11 = vnez %v5614_v49 }
 0x479   :  { %3544 = vmatprep.subr.msk.bf16.mxu1 %vm5649_vm12, %v3659_v15  ;;  %v5651_v19 = vsel %vm5396_vm0, 4294967295, %v5650_v19  ;;  %vm5402_vm2 = vmand %vm2148_vm4, %vm2197_vm13  ;;  %vm2183_vm13 = vcmp.lt.s32.totalorder %v2085_v37, 8 }
 0x47a   :  { %v5653_v24 = vsel %vm5402_vm2, 4294967295, %v5652_v24  ;;  %vm5408_vm6 = vmand %vm2131_vm15, %vm2180_vm7  ;;  %vm5661_vm15 = vnez %v5624_v1  ;;  %vm2134_vm2 = vcmp.ge.s32.totalorder %v2085_v37, 0 }
 0x47b   :  { %v5655_v9 = vsel %vm5408_vm6, 4294967295, %v5654_v9  ;;  %vm5658_vm12 = vmpackc.low %vm5656_vm5, %vm5657_vm11  ;;  %vm2198_vm5 = vcmp.lt.s32.totalorder %v2100_v20, 8  ;;  %vm2199_vm11 = vcmp.lt.s32.totalorder %v2101_v2, 8  ;;  %vm5671_vm6 = vnez %v5632_v14 }
 0x47c   :  { %3546 = vmatpush3.bf16.msk.msra.mxu1 %vm5658_vm12, %v3659_v15  ;;  %vm5419_vm9 = vmand %vm2132_vm8, %vm2181_vm10  ;;  %vm2150_vm10 = vcmp.ge.s32.totalorder %v2101_v2, 0  ;;  %vm5666_vm8 = vnez %v5627_v43  ;;  %vm5670_vm12 = vnez %v5634_v50 }
 0x47d   :  { %v5660_v31 = vsel %vm5419_vm9, 4294967295, %v5659_v31  ;;  %vm5663_vm4 = vmpackc.low %vm5661_vm15, %vm5662_vm14  ;;  %vm2133_vm15 = vcmp.ge.s32.totalorder %v2084_v29, 0  ;;  %vm2182_vm14 = vcmp.lt.s32.totalorder %v2084_v29, 8 }
 0x47e   :  { %3548 = vmatprep.subr.msk.bf16.mxu1 %vm5663_vm4, %v3659_v15  ;;  %vm5665_vm4 = vnez %v5630_v47  ;;  %vm5452_vm0 = vmand %vm2149_vm3, %vm2198_vm5  ;;  %vm2152_vm3 = vcmp.ge.s32.totalorder %v2103_v28, 0  ;;  %vm2201_vm5 = vcmp.lt.s32.totalorder %v2103_v28, 8 }
 0x47f   :  { %vm5667_vm7 = vmpackc.low %vm5665_vm4, %vm5666_vm8  ;;  %v5669_v33 = vsel %vm5452_vm0, 4294967295, %v5668_v33  ;;  %vm2151_vm4 = vcmp.ge.s32.totalorder %v2102_v25, 0  ;;  %vm2200_vm8 = vcmp.lt.s32.totalorder %v2102_v25, 8 }
 0x480   :  { %3550 = vmatpush3.bf16.msk.msra.mxu1 %vm5667_vm7, %v3659_v15  ;;  %vm5672_vm9 = vmpackc.low %vm5670_vm12, %vm5671_vm6  ;;  %vm5679_vm6 = vnez %v5647_v60  ;;  %vm5684_vm12 = vnez %v5653_v24 }
 0x481   :  { %3552 = vmatprep.subr.msk.bf16.mxu1 %vm5672_vm9, %v3659_v15  ;;  %vm5462_vm1 = vmand %vm2150_vm10, %vm2199_vm11  ;;  %vm5680_vm9 = vnez %v5642_v54 }
 0x482   :  { %vm5466_vm7 = vmand %vm2133_vm15, %vm2182_vm14  ;;  %vm5687_vm14 = vnez %v5669_v33 }
 0x483   :  { %v5676_v34 = vsel %vm5466_vm7, 4294967295, %v5675_v34  ;;  %vm5471_vm0 = vmand %vm2134_vm2, %vm2183_vm13  ;;  %vm5685_vm2 = vnez %v5651_v19  ;;  %vm2135_vm7 = vcmp.ge.s32.totalorder %v2086_v38, 0 }
 0x484   :  { %v5678_v21 = vsel %vm5471_vm0, 4294967295, %v5677_v21  ;;  %vm5681_vm10 = vmpackc.low %vm5679_vm6, %vm5680_vm9  ;;  %vm2184_vm6 = vcmp.lt.s32.totalorder %v2086_v38, 8 }
 0x485   :  { %3554 = vmatpush3.bf16.msk.msra.mxu1 %vm5681_vm10, %v3659_v15  ;;  %vm5482_vm11 = vmand %vm2151_vm4, %vm2200_vm8  ;;  %vm5688_vm4 = vnez %v5676_v34  ;;  %vm5689_vm8 = vnez %v5678_v21  ;;  %vm2136_vm10 = vcmp.ge.s32.totalorder %v2087_v41, 0 }
 0x486   :  { %v5683_v58 = vsel %vm5482_vm11, 4294967295, %v5682_v58  ;;  %vm5686_vm13 = vmpackc.low %vm5684_vm12, %vm5685_vm2  ;;  %vm2185_vm11 = vcmp.lt.s32.totalorder %v2087_v41, 8  ;;  %vm5690_vm2 = vnez %v5660_v31  ;;  %vm5691_vm12 = vnez %v5655_v9 }
 0x487   :  { %3556 = vmatprep.subr.msk.bf16.mxu1 %vm5686_vm13, %v3659_v15  ;;  %vm2250_vm15 = vmand %vm2152_vm3, %vm2201_vm5  ;;  %vm5693_vm5 = vnez %v5683_v58 }
 0x488   :  { %vm3559_vm0 = vmpackc.low %vm5462_vm1, %vm5687_vm14 }
 0x489   :  { %vm3561_vm9 = vmpackc.low %vm5689_vm8, %vm5688_vm4 }
 0x48a   :  { %vm5692_vm3 = vmpackc.low %vm5690_vm2, %vm5691_vm12 }
 0x48b   :  { %3558 = vmatpush3.bf16.msk.msra.mxu1 %vm5692_vm3, %v3659_v15  ;;  %vm3563_vm13 = vmpackc.low %vm2250_vm15, %vm5693_vm5 }
 0x48c   :  { %3560 = vmatprep.subr.msk.bf16.mxu1 %vm3559_vm0, %v3659_v15  ;;  %vm2233_vm1 = vmand %vm2135_vm7, %vm2184_vm6 }
 0x48d   :  { %vm2234_vm14 = vmand %vm2136_vm10, %vm2185_vm11 }
 0x48e   :  { %vm3565_vm4 = vmpackc.low %vm2234_vm14, %vm2233_vm1 }
 0x48f   :  { %3562 = vmatpush3.bf16.msk.msra.mxu1 %vm3561_vm9, %v3659_v15  ;;  %v2453_v27 = vpop.f32.mrb[106].mxu0 }
 0x490   :  { %3564 = vmatprep.subr.msk.bf16.mxu1 %vm3563_vm13, %v3659_v15  ;;  %v2455_v62 = vpop.f32.mrb[107].mxu0 }
 0x493   :  { %3566 = vmatpush3.bf16.msk.msra.mxu1 %vm3565_vm4, %v3659_v15 }
 0x496   :  { %2382 = vmatmul.mubr.f32.vlgmr.msra.gmra.mrb[106].mxu1 %v4989_v55 }
 0x546   :  { %v2014_v26 = vpop.f32.mrb[104].mxu1 }
 0x547   :  { %v2015_v45 = vadd.f32 %v2580_v6, %v2014_v26  ;;  %v3278_v44 = vpop.f32.mrb[105].mxu1 }
 0x549   :  { %2018 = vst [vmem:[%s5537_s14] sm:$0xff] %v2015_v45 }
 0x569   :  { %v2880_v5 = vpop.f32.mrb[106].mxu1 }
 0x56a   :  { %v2881_v10 = vpop.f32.mrb[107].mxu1 }
 0x56b   :  { %v2882_v49 = vadd.f32 %v2881_v10, %v2880_v5 }
 0x56d   :  { %v2454_v30 = vadd.f32 %v2882_v49, %v2453_v27 }
 0x56f   :  { %v2457_v42 = vmul.f32 %v5313_v4, %v2454_v30 }
 0x571   :  { %2458 = vst [vmem:[%s5538_s15] sm:$0xff] %v2457_v42 }
 0x572   :  { %2475 = vsyncpa [#allocation3], 1 }

</bundles_post_ra>
